<compile_context>
chip_gen: v7x
topology: tpu7x:2x2x1
jax: 0.10.0
libtpu: 0.0.40
codegen_flags: <defaults>
</compile_context>

<pallas_src>
import functools

import jax
import jax.numpy as jnp
from jax.experimental import pallas as pl
from jax.experimental.pallas import tpu as pltpu


def conv_block_kernel(x_ref, t1_ref, b1_ref, t2_ref, b2_ref, out_ref, *, img_rows):
    # x_ref  : (R, L)       f32   packed activations, R = image_groups_in_block * H,
    #                             L = lane_pack * W * Cin  (== lane_pack * W * Cout)
    # t1_ref : (3, L, Lh)   bf16  per-vertical-tap banded-Toeplitz conv1 weights
    # b1_ref : (1, Lh)      f32   conv1 bias tiled over lane_pack * W
    # t2_ref : (3, Lh, L)   bf16  per-vertical-tap banded-Toeplitz conv2 weights
    # b2_ref : (1, L)       f32   conv2 bias tiled over lane_pack * W
    # out_ref: (R, L)       f32
    x = x_ref[...]
    rows, lanes = x.shape

    # Hoisted boundary masks, shared by conv1's input shifts and conv2's output shifts
    # (both operate on width-L arrays since Cin == Cout).
    r = jax.lax.broadcasted_iota(jnp.int32, (rows, lanes), 0)
    not_first = (r % img_rows) != 0
    not_last = (r % img_rows) != (img_rows - 1)

    def shift_up(a):   # out[r] = a[r-1], zero on the first row of every image
        return jnp.where(not_first, pltpu.roll(a, 1, 0), jnp.zeros_like(a))

    def shift_dn(a):   # out[r] = a[r+1], zero on the last row of every image
        return jnp.where(not_last, pltpu.roll(a, rows - 1, 0), jnp.zeros_like(a))

    # ---- conv1 + bias + ReLU: three accumulating MXU matmuls (shift the narrow input) ----
    acc = jnp.dot(shift_up(x).astype(jnp.bfloat16), t1_ref[0],
                  preferred_element_type=jnp.float32)
    acc += jnp.dot(x.astype(jnp.bfloat16), t1_ref[1],
                   preferred_element_type=jnp.float32)
    acc += jnp.dot(shift_dn(x).astype(jnp.bfloat16), t1_ref[2],
                   preferred_element_type=jnp.float32)
    hid = jnp.maximum(acc + b1_ref[...], 0.0)          # f32 epilogue
    # dropout(drop_prob=0.0) is the identity -> no-op (pltpu.prng_* would be needed for p > 0).
    hid = hid.astype(jnp.bfloat16)                      # single bf16 cast of the wide hidden

    # ---- conv2: three matmuls on the unshifted hidden; shift the narrow f32 partial outputs ----
    p0 = jnp.dot(hid, t2_ref[0], preferred_element_type=jnp.float32)
    p1 = jnp.dot(hid, t2_ref[1], preferred_element_type=jnp.float32)
    p2 = jnp.dot(hid, t2_ref[2], preferred_element_type=jnp.float32)
    y = shift_up(p0) + p1 + shift_dn(p2)

    # ---- residual add straight from the aligned, unpadded input block ----
    out_ref[...] = x + y + b2_ref[...]


def _band_toeplitz_taps(w_hwio, width, lane_pack):
    """Per-vertical-tap matmul weights for a 3x3 'same' conv on lane-packed image rows.

    w_hwio (3, 3, Cin, Cout) -> (3, lane_pack*W*Cin, lane_pack*W*Cout).
    Tap kh multiplies the activations of image row (h + kh - 1).  Within a tap,
    T[w_src*Cin+ci, w_dst*Cout+co] = w[kh, w_src-w_dst+1, ci, co] for |w_src - w_dst| <= 1,
    block-diagonal over the lane_pack images packed side-by-side along lanes.
    """
    _, _, cin, cout = w_hwio.shape
    eye_p = jnp.eye(lane_pack, dtype=w_hwio.dtype)
    taps = []
    for kh in range(3):
        t = jnp.zeros((width * cin, width * cout), w_hwio.dtype)
        for kw in range(3):
            sel = jnp.eye(width, k=1 - kw, dtype=w_hwio.dtype)   # w_src = w_dst + kw - 1
            t = t + jnp.kron(sel, w_hwio[kh, kw])
        taps.append(jnp.kron(eye_p, t))                          # block-diag over packed images
    return jnp.stack(taps, axis=0)


def choose_lane_pack(n, width, cin, chid, cout):
    """Smallest number of images packed along lanes so activation/hidden/output rows are
    multiples of 128 lanes (unmasked vreg loads/stores). Falls back to 1 (still correct)."""
    for p in (1, 2, 4, 8):
        if n % p == 0 and all((p * width * c) % 128 == 0 for c in (cin, chid, cout)):
            return p
    return 1


def prepare_conv_block_params(w1, b1, w2, b2, *, width, lane_pack):
    """Build the kernel's matmul weights ONCE at parameter-setup time (not per forward call)."""
    t1 = _band_toeplitz_taps(w1, width, lane_pack).astype(jnp.bfloat16)
    t2 = _band_toeplitz_taps(w2, width, lane_pack).astype(jnp.bfloat16)
    b1t = jnp.tile(b1.astype(jnp.float32), lane_pack * width).reshape(1, -1)
    b2t = jnp.tile(b2.astype(jnp.float32), lane_pack * width).reshape(1, -1)
    return t1, b1t, t2, b2t


def conv_block_forward(x_nchw, t1, b1t, t2, b2t, *, lane_pack=1, grid_blocks=1):
    """ConvBlock forward: identity + conv2(dropout0(relu(conv1(x)))).  NCHW in / NCHW out.

    grid_blocks=1 (default) runs the whole batch as one grid step — best for small N*H on all
    generations (splitting a tiny M across v7x cores duplicates the weight DMA and leaves each
    MXU near-empty).  Only raise it once each block has >= ~256 rows; row blocks are split at
    whole-image-group granularity so the vertical halo stays in-block.
    """
    n, cin, h, w = x_nchw.shape
    lanes = lane_pack * w
    chid = t1.shape[2] // lanes
    cout = t2.shape[2] // lanes
    assert cin == cout, "residual add requires in_channels == out_channels (num_classes)"
    assert t1.shape == (3, lanes * cin, lanes * chid)
    assert t2.shape == (3, lanes * chid, lanes * cout)
    assert n % lane_pack == 0
    groups = n // lane_pack
    assert groups % grid_blocks == 0, "row blocks must be whole-image-group aligned"
    rows = groups * h
    rows_blk = rows // grid_blocks
    l_act = lanes * cin          # == lanes * cout
    l_hid = lanes * chid

    # Lane-dense packed layout: row = (image_group, image_row), lanes = (image_in_group, W, C).
    x2d = (jnp.transpose(x_nchw, (0, 2, 3, 1))                      # NHWC
           .reshape(groups, lane_pack, h, w * cin)
           .transpose(0, 2, 1, 3)
           .reshape(rows, l_act))

    y2d = pl.pallas_call(
        functools.partial(conv_block_kernel, img_rows=h),
        out_shape=jax.ShapeDtypeStruct((rows, l_act), jnp.float32),
        grid_spec=pltpu.PrefetchScalarGridSpec(
            num_scalar_prefetch=0,
            grid=(grid_blocks,),
            in_specs=[
                pl.BlockSpec((rows_blk, l_act), lambda i: (i, 0)),
                # Constant-index weight/bias specs.  Tiny at this shape; for large W/C they
                # should be single-buffered and tiled along their output (lane) dimension.
                pl.BlockSpec((3, l_act, l_hid), lambda i: (0, 0, 0)),
                pl.BlockSpec((1, l_hid), lambda i: (0, 0)),
                pl.BlockSpec((3, l_hid, l_act), lambda i: (0, 0, 0)),
                pl.BlockSpec((1, l_act), lambda i: (0, 0)),
            ],
            out_specs=pl.BlockSpec((rows_blk, l_act), lambda i: (i, 0)),
        ),
        compiler_params=pltpu.CompilerParams(
            dimension_semantics=("parallel",),
            vmem_limit_bytes=32 * 1024 * 1024,
        ),
    )(x2d, t1, b1t, t2, b2t)

    return jnp.transpose(
        y2d.reshape(groups, h, lane_pack, w, cout)
           .transpose(0, 2, 1, 3, 4)
           .reshape(n, h, w, cout),
        (0, 3, 1, 2))


def ref_conv_block_nchw(x_nchw, w1, b1, w2, b2):
    """Pure-JAX reference of the same module at the kernel's operand precision:
    conv operands rounded to bf16 (products then exact), f32 accumulation/epilogue."""
    def bf(a):
        return a.astype(jnp.bfloat16).astype(jnp.float32)
    dn = ("NHWC", "HWIO", "NHWC")
    x = jnp.transpose(x_nchw, (0, 2, 3, 1))
    h = jax.lax.conv_general_dilated(bf(x), bf(w1), (1, 1), ((1, 1), (1, 1)),
                                     dimension_numbers=dn,
                                     precision=jax.lax.Precision.HIGHEST) + b1
    h = jnp.maximum(h, 0.0)
    y = jax.lax.conv_general_dilated(bf(h), bf(w2), (1, 1), ((1, 1), (1, 1)),
                                     dimension_numbers=dn,
                                     precision=jax.lax.Precision.HIGHEST) + b2
    return jnp.transpose(x + y, (0, 3, 1, 2))


if __name__ == "__main__":
    # num_classes (= in_channels = out_channels) = 4, hidden = 32, 16x16 spatial, batch 2.
    N, C, H, W = 2, 4, 16, 16
    HIDDEN = 32

    key = jax.random.PRNGKey(0)
    kx, kw1, kb1, kw2, kb2 = jax.random.split(key, 5)
    x = jax.random.normal(kx, (N, C, H, W), jnp.float32)
    w1 = 0.1 * jax.random.normal(kw1, (3, 3, C, HIDDEN), jnp.float32)   # HWIO
    b1 = 0.1 * jax.random.normal(kb1, (HIDDEN,), jnp.float32)
    w2 = 0.1 * jax.random.normal(kw2, (3, 3, HIDDEN, C), jnp.float32)   # HWIO
    b2 = 0.1 * jax.random.normal(kb2, (C,), jnp.float32)

    pack = choose_lane_pack(N, W, C, HIDDEN, C)                 # -> 2 : 128-lane rows
    params = prepare_conv_block_params(w1, b1, w2, b2, width=W, lane_pack=pack)  # once

    fwd = jax.jit(functools.partial(conv_block_forward, lane_pack=pack))
    out = jax.block_until_ready(fwd(x, *params))

    ref = ref_conv_block_nchw(x, w1, b1, w2, b2)
    assert out.shape == (N, C, H, W)
    max_err = float(jnp.max(jnp.abs(out - ref)))
    assert jnp.allclose(out, ref, atol=2e-3, rtol=2e-3), f"max |err| = {max_err}"
    print("KERNEL_OK")
</pallas_src>

<mosaic_0001>
module attributes {stable_mosaic.version = 11 : i64} {
  func.func @conv_block_kernel(%arg0: i32, %arg1: memref<16x128xf32, #tpu.memory_space<vmem>>, %arg2: memref<3x128x1024xbf16, #tpu.memory_space<vmem>>, %arg3: memref<1x1024xf32, #tpu.memory_space<vmem>>, %arg4: memref<3x1024x128xbf16, #tpu.memory_space<vmem>>, %arg5: memref<1x128xf32, #tpu.memory_space<vmem>>, %arg6: memref<16x128xf32, #tpu.memory_space<vmem>>) attributes {dimension_semantics = [#tpu.dimension_semantics<parallel>], iteration_bounds = array<i64: 1>, scalar_prefetch = 0 : i64, scratch_operands = 0 : i64, tpu.core_type = #tpu.core_type<tc>, window_params = [{transform_indices = @transform_0, window_bounds = array<i64: 16, 128>}, {pipeline_mode = #tpu.pipeline_mode<synchronous>, transform_indices = @transform_1, window_bounds = array<i64: 3, 128, 1024>}, {pipeline_mode = #tpu.pipeline_mode<synchronous>, transform_indices = @transform_2, window_bounds = array<i64: 1, 1024>}, {pipeline_mode = #tpu.pipeline_mode<synchronous>, transform_indices = @transform_3, window_bounds = array<i64: 3, 1024, 128>}, {pipeline_mode = #tpu.pipeline_mode<synchronous>, transform_indices = @transform_4, window_bounds = array<i64: 1, 128>}, {transform_indices = @transform_5, window_bounds = array<i64: 16, 128>}]} {
    %c0 = arith.constant 0 : index
    %c0_0 = arith.constant 0 : index
    %0 = vector.load %arg1[%c0, %c0_0] : memref<16x128xf32, #tpu.memory_space<vmem>>, vector<16x128xf32>
    %1 = tpu.iota {dimensions = array<i32: 0>} : vector<16x128xi32>
    %c16_i32 = arith.constant 16 : i32
    %c0_i32 = arith.constant 0 : i32
    %2 = arith.cmpi eq, %c16_i32, %c0_i32 : i32
    %c1_i32 = arith.constant 1 : i32
    %3 = arith.select %2, %c1_i32, %c16_i32 : i32
    %4 = vector.broadcast %3 : i32 to vector<16x128xi32>
    %5 = arith.remsi %1, %4 : vector<16x128xi32>
    %c0_i32_1 = arith.constant 0 : i32
    %6 = vector.broadcast %c0_i32_1 : i32 to vector<16x128xi32>
    %7 = arith.cmpi ne, %5, %6 : vector<16x128xi32>
    %c0_i32_2 = arith.constant 0 : i32
    %8 = vector.broadcast %c0_i32_2 : i32 to vector<16x128xi32>
    %9 = arith.cmpi slt, %5, %8 : vector<16x128xi32>
    %c0_i32_3 = arith.constant 0 : i32
    %10 = arith.cmpi slt, %3, %c0_i32_3 : i32
    %11 = vector.broadcast %10 : i1 to vector<16x128xi1>
    %12 = vector.broadcast %11 : vector<16x128xi1> to vector<16x128xi1>
    %13 = arith.xori %9, %12 : vector<16x128xi1>
    %14 = arith.andi %13, %7 : vector<16x128xi1>
    %15 = vector.broadcast %3 : i32 to vector<16x128xi32>
    %16 = arith.addi %5, %15 : vector<16x128xi32>
    %17 = arith.select %14, %16, %5 : vector<16x128xi1>, vector<16x128xi32>
    %c0_i32_4 = arith.constant 0 : i32
    %18 = vector.broadcast %c0_i32_4 : i32 to vector<16x128xi32>
    %19 = arith.cmpi ne, %17, %18 : vector<16x128xi32>
    %c16_i32_5 = arith.constant 16 : i32
    %c0_i32_6 = arith.constant 0 : i32
    %20 = arith.cmpi eq, %c16_i32_5, %c0_i32_6 : i32
    %c1_i32_7 = arith.constant 1 : i32
    %21 = arith.select %20, %c1_i32_7, %c16_i32_5 : i32
    %22 = vector.broadcast %21 : i32 to vector<16x128xi32>
    %23 = arith.remsi %1, %22 : vector<16x128xi32>
    %c0_i32_8 = arith.constant 0 : i32
    %24 = vector.broadcast %c0_i32_8 : i32 to vector<16x128xi32>
    %25 = arith.cmpi ne, %23, %24 : vector<16x128xi32>
    %c0_i32_9 = arith.constant 0 : i32
    %26 = vector.broadcast %c0_i32_9 : i32 to vector<16x128xi32>
    %27 = arith.cmpi slt, %23, %26 : vector<16x128xi32>
    %c0_i32_10 = arith.constant 0 : i32
    %28 = arith.cmpi slt, %21, %c0_i32_10 : i32
    %29 = vector.broadcast %28 : i1 to vector<16x128xi1>
    %30 = vector.broadcast %29 : vector<16x128xi1> to vector<16x128xi1>
    %31 = arith.xori %27, %30 : vector<16x128xi1>
    %32 = arith.andi %31, %25 : vector<16x128xi1>
    %33 = vector.broadcast %21 : i32 to vector<16x128xi32>
    %34 = arith.addi %23, %33 : vector<16x128xi32>
    %35 = arith.select %32, %34, %23 : vector<16x128xi1>, vector<16x128xi32>
    %c15_i32 = arith.constant 15 : i32
    %36 = vector.broadcast %c15_i32 : i32 to vector<16x128xi32>
    %37 = arith.cmpi ne, %35, %36 : vector<16x128xi32>
    %c1_i32_11 = arith.constant 1 : i32
    %38 = tpu.dynamic_rotate %0 by %c1_i32_11 dim 0 : vector<16x128xf32>, i32 -> vector<16x128xf32>
    %cst = arith.constant 0.000000e+00 : f32
    %39 = vector.broadcast %cst : f32 to vector<16x128xf32>
    %40 = arith.select %19, %38, %39 : vector<16x128xi1>, vector<16x128xf32>
    %41 = arith.truncf %40 : vector<16x128xf32> to vector<16x128xbf16>
    %c0_12 = arith.constant 0 : index
    %c0_13 = arith.constant 0 : index
    %c0_14 = arith.constant 0 : index
    %42 = vector.load %arg2[%c0_12, %c0_13, %c0_14] : memref<3x128x1024xbf16, #tpu.memory_space<vmem>>, vector<1x128x1024xbf16>
    %43 = vector.shape_cast %42 : vector<1x128x1024xbf16> to vector<128x1024xbf16>
    %cst_15 = arith.constant dense<0.000000e+00> : vector<16x1024xf32>
    %44 = tpu.matmul %41, %43, %cst_15 {dimension_numbers = #tpu.dot_dimension_numbers<[1], [0], [0], [1], [0, 0, 1, 1], [], []>} : vector<16x128xbf16>, vector<128x1024xbf16>, vector<16x1024xf32> -> vector<16x1024xf32>
    %45 = arith.truncf %0 : vector<16x128xf32> to vector<16x128xbf16>
    %c1 = arith.constant 1 : index
    %c0_16 = arith.constant 0 : index
    %c0_17 = arith.constant 0 : index
    %46 = vector.load %arg2[%c1, %c0_16, %c0_17] : memref<3x128x1024xbf16, #tpu.memory_space<vmem>>, vector<1x128x1024xbf16>
    %47 = vector.shape_cast %46 : vector<1x128x1024xbf16> to vector<128x1024xbf16>
    %cst_18 = arith.constant dense<0.000000e+00> : vector<16x1024xf32>
    %48 = tpu.matmul %45, %47, %cst_18 {dimension_numbers = #tpu.dot_dimension_numbers<[1], [0], [0], [1], [0, 0, 1, 1], [], []>} : vector<16x128xbf16>, vector<128x1024xbf16>, vector<16x1024xf32> -> vector<16x1024xf32>
    %49 = arith.addf %44, %48 : vector<16x1024xf32>
    %c15_i32_19 = arith.constant 15 : i32
    %50 = tpu.dynamic_rotate %0 by %c15_i32_19 dim 0 : vector<16x128xf32>, i32 -> vector<16x128xf32>
    %cst_20 = arith.constant 0.000000e+00 : f32
    %51 = vector.broadcast %cst_20 : f32 to vector<16x128xf32>
    %52 = arith.select %37, %50, %51 : vector<16x128xi1>, vector<16x128xf32>
    %53 = arith.truncf %52 : vector<16x128xf32> to vector<16x128xbf16>
    %c2 = arith.constant 2 : index
    %c0_21 = arith.constant 0 : index
    %c0_22 = arith.constant 0 : index
    %54 = vector.load %arg2[%c2, %c0_21, %c0_22] : memref<3x128x1024xbf16, #tpu.memory_space<vmem>>, vector<1x128x1024xbf16>
    %55 = vector.shape_cast %54 : vector<1x128x1024xbf16> to vector<128x1024xbf16>
    %cst_23 = arith.constant dense<0.000000e+00> : vector<16x1024xf32>
    %56 = tpu.matmul %53, %55, %cst_23 {dimension_numbers = #tpu.dot_dimension_numbers<[1], [0], [0], [1], [0, 0, 1, 1], [], []>} : vector<16x128xbf16>, vector<128x1024xbf16>, vector<16x1024xf32> -> vector<16x1024xf32>
    %57 = arith.addf %49, %56 : vector<16x1024xf32>
    %c0_24 = arith.constant 0 : index
    %c0_25 = arith.constant 0 : index
    %58 = vector.load %arg3[%c0_24, %c0_25] : memref<1x1024xf32, #tpu.memory_space<vmem>>, vector<1x1024xf32>
    %59 = vector.broadcast %58 : vector<1x1024xf32> to vector<16x1024xf32>
    %60 = arith.addf %57, %59 : vector<16x1024xf32>
    %cst_26 = arith.constant 0.000000e+00 : f32
    %61 = vector.broadcast %cst_26 : f32 to vector<16x1024xf32>
    %62 = arith.maximumf %60, %61 : vector<16x1024xf32>
    %63 = arith.truncf %62 : vector<16x1024xf32> to vector<16x1024xbf16>
    %c0_27 = arith.constant 0 : index
    %c0_28 = arith.constant 0 : index
    %c0_29 = arith.constant 0 : index
    %64 = vector.load %arg4[%c0_27, %c0_28, %c0_29] : memref<3x1024x128xbf16, #tpu.memory_space<vmem>>, vector<1x1024x128xbf16>
    %65 = vector.shape_cast %64 : vector<1x1024x128xbf16> to vector<1024x128xbf16>
    %cst_30 = arith.constant dense<0.000000e+00> : vector<16x128xf32>
    %66 = tpu.matmul %63, %65, %cst_30 {dimension_numbers = #tpu.dot_dimension_numbers<[1], [0], [0], [1], [0, 0, 1, 1], [], []>} : vector<16x1024xbf16>, vector<1024x128xbf16>, vector<16x128xf32> -> vector<16x128xf32>
    %c1_31 = arith.constant 1 : index
    %c0_32 = arith.constant 0 : index
    %c0_33 = arith.constant 0 : index
    %67 = vector.load %arg4[%c1_31, %c0_32, %c0_33] : memref<3x1024x128xbf16, #tpu.memory_space<vmem>>, vector<1x1024x128xbf16>
    %68 = vector.shape_cast %67 : vector<1x1024x128xbf16> to vector<1024x128xbf16>
    %cst_34 = arith.constant dense<0.000000e+00> : vector<16x128xf32>
    %69 = tpu.matmul %63, %68, %cst_34 {dimension_numbers = #tpu.dot_dimension_numbers<[1], [0], [0], [1], [0, 0, 1, 1], [], []>} : vector<16x1024xbf16>, vector<1024x128xbf16>, vector<16x128xf32> -> vector<16x128xf32>
    %c2_35 = arith.constant 2 : index
    %c0_36 = arith.constant 0 : index
    %c0_37 = arith.constant 0 : index
    %70 = vector.load %arg4[%c2_35, %c0_36, %c0_37] : memref<3x1024x128xbf16, #tpu.memory_space<vmem>>, vector<1x1024x128xbf16>
    %71 = vector.shape_cast %70 : vector<1x1024x128xbf16> to vector<1024x128xbf16>
    %cst_38 = arith.constant dense<0.000000e+00> : vector<16x128xf32>
    %72 = tpu.matmul %63, %71, %cst_38 {dimension_numbers = #tpu.dot_dimension_numbers<[1], [0], [0], [1], [0, 0, 1, 1], [], []>} : vector<16x1024xbf16>, vector<1024x128xbf16>, vector<16x128xf32> -> vector<16x128xf32>
    %c1_i32_39 = arith.constant 1 : i32
    %73 = tpu.dynamic_rotate %66 by %c1_i32_39 dim 0 : vector<16x128xf32>, i32 -> vector<16x128xf32>
    %cst_40 = arith.constant 0.000000e+00 : f32
    %74 = vector.broadcast %cst_40 : f32 to vector<16x128xf32>
    %75 = arith.select %19, %73, %74 : vector<16x128xi1>, vector<16x128xf32>
    %76 = arith.addf %75, %69 : vector<16x128xf32>
    %c15_i32_41 = arith.constant 15 : i32
    %77 = tpu.dynamic_rotate %72 by %c15_i32_41 dim 0 : vector<16x128xf32>, i32 -> vector<16x128xf32>
    %cst_42 = arith.constant 0.000000e+00 : f32
    %78 = vector.broadcast %cst_42 : f32 to vector<16x128xf32>
    %79 = arith.select %37, %77, %78 : vector<16x128xi1>, vector<16x128xf32>
    %80 = arith.addf %76, %79 : vector<16x128xf32>
    %81 = arith.addf %0, %80 : vector<16x128xf32>
    %c0_43 = arith.constant 0 : index
    %c0_44 = arith.constant 0 : index
    %82 = vector.load %arg5[%c0_43, %c0_44] : memref<1x128xf32, #tpu.memory_space<vmem>>, vector<1x128xf32>
    %83 = vector.broadcast %82 : vector<1x128xf32> to vector<16x128xf32>
    %84 = arith.addf %81, %83 : vector<16x128xf32>
    %c0_45 = arith.constant 0 : index
    %c0_46 = arith.constant 0 : index
    %85 = vector.load %arg6[%c0_45, %c0_46] : memref<16x128xf32, #tpu.memory_space<vmem>>, vector<16x128xf32>
    tpu.vector_store %arg6[%c0_45, %c0_46], %84 {strides = array<i32>} : memref<16x128xf32, #tpu.memory_space<vmem>>, vector<16x128xf32>,
    return
  }
  func.func @transform_0(%arg0: i32) -> (i32, i32) {
    %c0_i32 = arith.constant 0 : i32
    %c0_i32_0 = arith.constant 0 : i32
    return %arg0, %c0_i32 : i32, i32
  }
  func.func @transform_1(%arg0: i32) -> (i32, i32, i32) {
    %c0_i32 = arith.constant 0 : i32
    %c0_i32_0 = arith.constant 0 : i32
    %c0_i32_1 = arith.constant 0 : i32
    %c0_i32_2 = arith.constant 0 : i32
    return %c0_i32, %c0_i32_0, %c0_i32_1 : i32, i32, i32
  }
  func.func @transform_2(%arg0: i32) -> (i32, i32) {
    %c0_i32 = arith.constant 0 : i32
    %c0_i32_0 = arith.constant 0 : i32
    %c0_i32_1 = arith.constant 0 : i32
    return %c0_i32, %c0_i32_0 : i32, i32
  }
  func.func @transform_3(%arg0: i32) -> (i32, i32, i32) {
    %c0_i32 = arith.constant 0 : i32
    %c0_i32_0 = arith.constant 0 : i32
    %c0_i32_1 = arith.constant 0 : i32
    %c0_i32_2 = arith.constant 0 : i32
    return %c0_i32, %c0_i32_0, %c0_i32_1 : i32, i32, i32
  }
  func.func @transform_4(%arg0: i32) -> (i32, i32) {
    %c0_i32 = arith.constant 0 : i32
    %c0_i32_0 = arith.constant 0 : i32
    %c0_i32_1 = arith.constant 0 : i32
    return %c0_i32, %c0_i32_0 : i32, i32
  }
  func.func @transform_5(%arg0: i32) -> (i32, i32) {
    %c0_i32 = arith.constant 0 : i32
    %c0_i32_0 = arith.constant 0 : i32
    return %arg0, %c0_i32 : i32, i32
  }
}

</mosaic_0001>

<bundles_post_ra>
// kernel: conv_block_forward.1
= control target key start
LH: loop header
LB: loop body
LE: loop exit
PB: predicated region body
PF: predicated region fallthrough
CT: control target
= control target key end

     0   :  { %10 = vsyncpa [#allocation3], 0  ;;  %s5148_s0 = inlined_call_operand.vmem [shape: f32[16,128], index: 0, kind: input, shape index: {}]   ;;  %s5149_s1 = inlined_call_operand.hbm [shape: bf16[3,128,1024], index: 1, kind: input, shape index: {}]   ;;  %s5150_s2 = inlined_call_operand.vmem [shape: f32[1,1024], index: 2, kind: input, shape index: {}]   ;;  %s5151_s3 = inlined_call_operand.hbm [shape: bf16[3,1024,128], index: 3, kind: input, shape index: {}]   ;;  %s5152_s4 = inlined_call_operand.vmem [shape: f32[1,128], index: 4, kind: input, shape index: {}]   ;;  %s5153_s5 = inlined_call_operand.vmem [shape: f32[16,128], index: 5, kind: output, shape index: {}]  }
   0x1   :  { %11 = vsyncpa [#allocation5], 0  ;;  %s4887_s18 = smov [#allocation2]   ;;  %s4839_s22 = scalar_lea.hbm %s5149_s1, 24576 }
   0x2   :  { %s19_s19 = sshll.u32 %s4887_s18, 4  ;;  %p4840_p0 = scmp.ne.s32.totalorder %s5149_s1, %s4839_s22  ;;  %s20_s19 = int_to_ptr.vmem [resolvable:$true] %s19_s19 }
   0x3   :  { %p4843_p1 = scmp.lt.u32.totalorder %s4839_s22, %s5149_s1 }
   0x5   :  { %p4845_p2 = pnand %p4843_p1, %p4840_p0 }
   0x7   :  { %4848 = shalt.err (!%p4845_p2)
}
   0x8   :  { %s4849_s27 = scalar_lea.vmem %s20_s19, 24576  ;;  %p4854_p4 = scmp.lt.s32.totalorder %s20_s19, %s20_s19 }
   0x9   :  { %p4850_p3 = scmp.ne.s32.totalorder %s20_s19, %s4849_s27  ;;  %p4855_p5 = scmp.lt.s32.totalorder %s4849_s27, %s4849_s27 }
   0xb   :  { %p4856_p6 = por %p4855_p5, %p4854_p4 }
   0xd   :  { %p4857_p7 = pnand %p4856_p6, %p4850_p3 }
   0xf   :  { %4860 = shalt.err (!%p4857_p7)
}
  0x10   :  { %s4888_s28 = smov 512   ;;  %s4889_s29 = smov 32  }
  0x11   :  { %25 = dma.hbm_to_vmem [thread:$0]  %s5149_s1, 24576, %s20_s19, [#allocation3], %s4888_s28, %s4888_s28, %s4889_s29  }
  0x12   :  { %s4890_s7 = smov [#allocation4]   ;;  %s4861_s11 = scalar_lea.hbm %s5151_s3, 24576 }
  0x13   :  { %s33_s8 = sshll.u32 %s4890_s7, 4  ;;  %p4862_p8 = scmp.ne.s32.totalorder %s5151_s3, %s4861_s11  ;;  %s34_s8 = int_to_ptr.vmem [resolvable:$true] %s33_s8 }
  0x14   :  { %p4865_p9 = scmp.lt.u32.totalorder %s4861_s11, %s5151_s3 }
  0x16   :  { %p4867_p10 = pnand %p4865_p9, %p4862_p8 }
  0x18   :  { %4870 = shalt.err (!%p4867_p10)
}
  0x19   :  { %s4871_s16 = scalar_lea.vmem %s34_s8, 24576  ;;  %p4876_p12 = scmp.lt.s32.totalorder %s34_s8, %s34_s8 }
  0x1a   :  { %p4872_p11 = scmp.ne.s32.totalorder %s34_s8, %s4871_s16  ;;  %p4877_p13 = scmp.lt.s32.totalorder %s4871_s16, %s4871_s16 }
  0x1c   :  { %p4878_p0 = por %p4877_p13, %p4876_p12 }
  0x1e   :  { %p4879_p1 = pnand %p4878_p0, %p4872_p11 }
  0x20   :  { %4882 = shalt.err (!%p4879_p1)
}
  0x21   :  { %s4891_s1 = smov 64   ;;  %s4892_s17 = smov 4  }
  0x22   :  { %39 = dma.hbm_to_vmem [thread:$0]  %s5151_s3, 24576, %s34_s8, [#allocation5], %s4891_s1, %s4891_s1, %s4892_s17  }
  0x23   :  { %4883 = dma.done.wait [#allocation3], 24576  }
  0x24   :  { %4884 = vsyncadd [#allocation3], 4294942720 }
  0x25   :  { %4885 = dma.done.wait [#allocation5], 24576  }
  0x26   :  { %4886 = vsyncadd [#allocation5], 4294942720  ;;  %v4893_v0 = vmov 0   ;;  %v156_v1 = vld [vmem:[#allocation2 + $0x200] sm:$0xff]  ;;  %v157_v3 = vld [vmem:[#allocation2 + $0x208] sm:$0xff]  ;;  %vm4894_vm2 = vmmov 1  }
  0x27   :  { %572 = vmatprep.mubr.bf16.mxu0 %v4893_v0  ;;  %615 = vmatprep.mubr.bf16.mxu1 %v4893_v0  ;;  %v160_v2 = vld [vmem:[#allocation2 + $0x220] sm:$0xff]  ;;  %v161_v5 = vld [vmem:[#allocation2 + $0x228] sm:$0xff]  ;;  %v158_v63 = vld [vmem:[#allocation2 + $0x210] sm:$0xff] }
  0x28   :  { %v3933_v4 = vcombine.high %v156_v1, %v160_v2  ;;  %v3932_v6 = vcombine.low %v156_v1, %v160_v2  ;;  %v164_v7 = vld [vmem:[#allocation2 + $0x240] sm:$0xff]  ;;  %v3935_v9 = vcombine.high %v157_v3, %v161_v5  ;;  %v3934_v10 = vcombine.low %v157_v3, %v161_v5  ;;  %v165_v12 = vld [vmem:[#allocation2 + $0x248] sm:$0xff]  ;;  %v162_v1 = vld [vmem:[#allocation2 + $0x230] sm:$0xff] }
  0x29   :  { %v168_v8 = vld [vmem:[#allocation2 + $0x260] sm:$0xff]  ;;  %v169_v13 = vld [vmem:[#allocation2 + $0x268] sm:$0xff]  ;;  %v159_v2 = vld [vmem:[#allocation2 + $0x218] sm:$0xff] }
  0x2a   :  { %v3941_v11 = vcombine.high %v164_v7, %v168_v8  ;;  %v172_v14 = vld [vmem:[#allocation2 + $0x280] sm:$0xff]  ;;  %540 = vmatprep.subr.bf16.mxu0 %v3933_v4  ;;  %v3943_v15 = vcombine.high %v165_v12, %v169_v13  ;;  %v173_v17 = vld [vmem:[#allocation2 + $0x288] sm:$0xff]  ;;  %583 = vmatprep.subr.bf16.mxu1 %v3935_v9  ;;  %v3940_v19 = vcombine.low %v164_v7, %v168_v8  ;;  %v163_v3 = vld [vmem:[#allocation2 + $0x238] sm:$0xff] }
  0x2b   :  { %v176_v16 = vld [vmem:[#allocation2 + $0x2a0] sm:$0xff]  ;;  %v177_v18 = vld [vmem:[#allocation2 + $0x2a8] sm:$0xff]  ;;  %541 = vmatpush1.bf16.msra.mxu0 %v3932_v6  ;;  %584 = vmatpush1.bf16.msra.mxu1 %v3934_v10  ;;  %v3942_v20 = vcombine.low %v165_v12, %v169_v13  ;;  %v3937_v8 = vcombine.high %v158_v63, %v162_v1  ;;  %v3939_v9 = vcombine.high %v159_v2, %v163_v3  ;;  %v166_v10 = vld [vmem:[#allocation2 + $0x250] sm:$0xff] }
  0x2c   :  { %542 = vmatprep.subr.bf16.mxu0 %v3941_v11  ;;  %v3949_v21 = vcombine.high %v172_v14, %v176_v16  ;;  %585 = vmatprep.subr.bf16.mxu1 %v3943_v15  ;;  %v3951_v22 = vcombine.high %v173_v17, %v177_v18  ;;  %v180_v23 = vld [vmem:[#allocation2 + $0x2c0] sm:$0xff]  ;;  %v181_v25 = vld [vmem:[#allocation2 + $0x2c8] sm:$0xff]  ;;  %v3948_v27 = vcombine.low %v172_v14, %v176_v16  ;;  %v170_v11 = vld [vmem:[#allocation2 + $0x270] sm:$0xff] }
  0x2d   :  { %v184_v24 = vld [vmem:[#allocation2 + $0x2e0] sm:$0xff]  ;;  %v185_v26 = vld [vmem:[#allocation2 + $0x2e8] sm:$0xff]  ;;  %v3950_v28 = vcombine.low %v173_v17, %v177_v18  ;;  %v167_v13 = vld [vmem:[#allocation2 + $0x258] sm:$0xff]  ;;  %v3936_v15 = vcombine.low %v158_v63, %v162_v1  ;;  %v3938_v16 = vcombine.low %v159_v2, %v163_v3  ;;  %v3945_v17 = vcombine.high %v166_v10, %v170_v11 }
  0x2e   :  { %v3957_v29 = vcombine.high %v180_v23, %v184_v24  ;;  %v3959_v30 = vcombine.high %v181_v25, %v185_v26  ;;  %v188_v31 = vld [vmem:[#allocation2 + $0x300] sm:$0xff]  ;;  %v189_v33 = vld [vmem:[#allocation2 + $0x308] sm:$0xff]  ;;  %v3956_v35 = vcombine.low %v180_v23, %v184_v24  ;;  %v3958_v36 = vcombine.low %v181_v25, %v185_v26  ;;  %v171_v14 = vld [vmem:[#allocation2 + $0x278] sm:$0xff] }
  0x2f   :  { %543 = vmatpush1.bf16.msra.mxu0 %v3940_v19  ;;  %586 = vmatpush1.bf16.msra.mxu1 %v3942_v20  ;;  %v192_v32 = vld [vmem:[#allocation2 + $0x320] sm:$0xff]  ;;  %v193_v34 = vld [vmem:[#allocation2 + $0x328] sm:$0xff]  ;;  %v3947_v18 = vcombine.high %v167_v13, %v171_v14  ;;  %v174_v19 = vld [vmem:[#allocation2 + $0x290] sm:$0xff]  ;;  %v3944_v23 = vcombine.low %v166_v10, %v170_v11  ;;  %v3946_v24 = vcombine.low %v167_v13, %v171_v14 }
  0x30   :  { %544 = vmatprep.subr.bf16.mxu0 %v3949_v21  ;;  %587 = vmatprep.subr.bf16.mxu1 %v3951_v22  ;;  %v3965_v37 = vcombine.high %v188_v31, %v192_v32  ;;  %v3967_v38 = vcombine.high %v189_v33, %v193_v34  ;;  %v196_v39 = vld [vmem:[#allocation2 + $0x340] sm:$0xff]  ;;  %v197_v41 = vld [vmem:[#allocation2 + $0x348] sm:$0xff]  ;;  %v3964_v43 = vcombine.low %v188_v31, %v192_v32  ;;  %v178_v20 = vld [vmem:[#allocation2 + $0x2b0] sm:$0xff] }
  0x31   :  { %v200_v40 = vld [vmem:[#allocation2 + $0x360] sm:$0xff]  ;;  %v201_v42 = vld [vmem:[#allocation2 + $0x368] sm:$0xff]  ;;  %v3966_v44 = vcombine.low %v189_v33, %v193_v34  ;;  %v175_v21 = vld [vmem:[#allocation2 + $0x298] sm:$0xff]  ;;  %v3953_v25 = vcombine.high %v174_v19, %v178_v20  ;;  %v3952_v31 = vcombine.low %v174_v19, %v178_v20 }
  0x32   :  { %v3973_v45 = vcombine.high %v196_v39, %v200_v40  ;;  %v3975_v46 = vcombine.high %v197_v41, %v201_v42  ;;  %v204_v47 = vld [vmem:[#allocation2 + $0x380] sm:$0xff]  ;;  %v205_v49 = vld [vmem:[#allocation2 + $0x388] sm:$0xff]  ;;  %v3972_v51 = vcombine.low %v196_v39, %v200_v40  ;;  %v3974_v52 = vcombine.low %v197_v41, %v201_v42  ;;  %v179_v22 = vld [vmem:[#allocation2 + $0x2b8] sm:$0xff] }
  0x33   :  { %545 = vmatpush1.bf16.msra.mxu0 %v3948_v27  ;;  %588 = vmatpush1.bf16.msra.mxu1 %v3950_v28  ;;  %v208_v48 = vld [vmem:[#allocation2 + $0x3a0] sm:$0xff]  ;;  %v209_v50 = vld [vmem:[#allocation2 + $0x3a8] sm:$0xff]  ;;  %v3955_v26 = vcombine.high %v175_v21, %v179_v22  ;;  %v182_v27 = vld [vmem:[#allocation2 + $0x2d0] sm:$0xff]  ;;  %v3954_v32 = vcombine.low %v175_v21, %v179_v22 }
  0x34   :  { %546 = vmatprep.subr.bf16.mxu0 %v3957_v29  ;;  %589 = vmatprep.subr.bf16.mxu1 %v3959_v30  ;;  %v3981_v53 = vcombine.high %v204_v47, %v208_v48  ;;  %v3983_v54 = vcombine.high %v205_v49, %v209_v50  ;;  %v212_v55 = vld [vmem:[#allocation2 + $0x3c0] sm:$0xff]  ;;  %v213_v57 = vld [vmem:[#allocation2 + $0x3c8] sm:$0xff]  ;;  %v3980_v59 = vcombine.low %v204_v47, %v208_v48  ;;  %v186_v28 = vld [vmem:[#allocation2 + $0x2f0] sm:$0xff] }
  0x35   :  { %v216_v56 = vld [vmem:[#allocation2 + $0x3e0] sm:$0xff]  ;;  %v217_v58 = vld [vmem:[#allocation2 + $0x3e8] sm:$0xff]  ;;  %v3982_v60 = vcombine.low %v205_v49, %v209_v50  ;;  %v183_v29 = vld [vmem:[#allocation2 + $0x2d8] sm:$0xff]  ;;  %v3961_v33 = vcombine.high %v182_v27, %v186_v28  ;;  %v3960_v39 = vcombine.low %v182_v27, %v186_v28 }
  0x36   :  { %v3989_v61 = vcombine.high %v212_v55, %v216_v56  ;;  %v3991_v62 = vcombine.high %v213_v57, %v217_v58  ;;  %v3988_v4 = vcombine.low %v212_v55, %v216_v56  ;;  %v4954_v5 = vld [vmem:[%s5148_s0] sm:$0xff]  ;;  %v4959_v6 = vld [vmem:[%s5148_s0 + $0x8] sm:$0xff]  ;;  %v3990_v7 = vcombine.low %v213_v57, %v217_v58  ;;  %v187_v30 = vld [vmem:[#allocation2 + $0x2f8] sm:$0xff] }
  0x37   :  { %547 = vmatpush1.bf16.msra.mxu0 %v3956_v35  ;;  %590 = vmatpush1.bf16.msra.mxu1 %v3958_v36  ;;  %v4963_v12 = vpack.c.bf16 %v4959_v6, %v4954_v5  ;;  %v3963_v34 = vcombine.high %v183_v29, %v187_v30  ;;  %v190_v35 = vld [vmem:[#allocation2 + $0x310] sm:$0xff]  ;;  %v3962_v40 = vcombine.low %v183_v29, %v187_v30  ;;  %v106_v20 = vld [vmem:[#allocation2 + $0x80] sm:$0xff] }
  0x38   :  { %548 = vmatprep.subr.bf16.mxu0 %v3965_v37  ;;  %591 = vmatprep.subr.bf16.mxu1 %v3967_v38  ;;  %v194_v36 = vld [vmem:[#allocation2 + $0x330] sm:$0xff]  ;;  %v191_v37 = vld [vmem:[#allocation2 + $0x318] sm:$0xff]  ;;  %v110_v21 = vld [vmem:[#allocation2 + $0xa0] sm:$0xff] }
  0x39   :  { %v195_v38 = vld [vmem:[#allocation2 + $0x338] sm:$0xff]  ;;  %v3969_v41 = vcombine.high %v190_v35, %v194_v36  ;;  %v3968_v47 = vcombine.low %v190_v35, %v194_v36  ;;  %v114_v28 = vld [vmem:[#allocation2 + $0xc0] sm:$0xff]  ;;  %v4013_v30 = vcombine.high %v106_v20, %v110_v21  ;;  %v4012_v35 = vcombine.low %v106_v20, %v110_v21 }
  0x3a   :  { %v3971_v42 = vcombine.high %v191_v37, %v195_v38  ;;  %v3970_v48 = vcombine.low %v191_v37, %v195_v38  ;;  %v122_v36 = vld [vmem:[#allocation2 + $0x100] sm:$0xff]  ;;  %v93_v20 = vld [vmem:[#allocation2 + $0x18] sm:$0xff] }
  0x3b   :  { %549 = vmatpush1.bf16.msra.mxu0 %v3964_v43  ;;  %592 = vmatpush1.bf16.msra.mxu1 %v3966_v44  ;;  %v198_v43 = vld [vmem:[#allocation2 + $0x350] sm:$0xff]  ;;  %v97_v21 = vld [vmem:[#allocation2 + $0x38] sm:$0xff] }
  0x3c   :  { %550 = vmatprep.subr.bf16.mxu0 %v3973_v45  ;;  %593 = vmatprep.subr.bf16.mxu1 %v3975_v46  ;;  %v202_v44 = vld [vmem:[#allocation2 + $0x370] sm:$0xff]  ;;  %v199_v45 = vld [vmem:[#allocation2 + $0x358] sm:$0xff] }
  0x3d   :  { %v203_v46 = vld [vmem:[#allocation2 + $0x378] sm:$0xff]  ;;  %v3977_v49 = vcombine.high %v198_v43, %v202_v44  ;;  %v3976_v55 = vcombine.low %v198_v43, %v202_v44  ;;  %v130_v44 = vld [vmem:[#allocation2 + $0x140] sm:$0xff] }
  0x3e   :  { %v3979_v50 = vcombine.high %v199_v45, %v203_v46  ;;  %v3978_v56 = vcombine.low %v199_v45, %v203_v46 }
  0x3f   :  { %551 = vmatpush1.bf16.msra.mxu0 %v3972_v51  ;;  %594 = vmatpush1.bf16.msra.mxu1 %v3974_v52  ;;  %v206_v51 = vld [vmem:[#allocation2 + $0x390] sm:$0xff] }
  0x40   :  { %552 = vmatprep.subr.bf16.mxu0 %v3981_v53  ;;  %595 = vmatprep.subr.bf16.mxu1 %v3983_v54  ;;  %v210_v52 = vld [vmem:[#allocation2 + $0x3b0] sm:$0xff]  ;;  %v207_v53 = vld [vmem:[#allocation2 + $0x398] sm:$0xff] }
  0x41   :  { %v211_v54 = vld [vmem:[#allocation2 + $0x3b8] sm:$0xff]  ;;  %v3985_v57 = vcombine.high %v206_v51, %v210_v52  ;;  %v3984_v63 = vcombine.low %v206_v51, %v210_v52  ;;  %v135_v51 = vld [vmem:[#allocation2 + $0x168] sm:$0xff] }
  0x42   :  { %v3987_v58 = vcombine.high %v207_v53, %v211_v54  ;;  %v3986_v1 = vcombine.low %v207_v53, %v211_v54  ;;  %v138_v53 = vld [vmem:[#allocation2 + $0x180] sm:$0xff] }
  0x43   :  { %553 = vmatpush1.bf16.msra.mxu0 %v3980_v59  ;;  %596 = vmatpush1.bf16.msra.mxu1 %v3982_v60  ;;  %v214_v59 = vld [vmem:[#allocation2 + $0x3d0] sm:$0xff] }
  0x44   :  { %554 = vmatprep.subr.bf16.mxu0 %v3989_v61  ;;  %597 = vmatprep.subr.bf16.mxu1 %v3991_v62  ;;  %v218_v60 = vld [vmem:[#allocation2 + $0x3f0] sm:$0xff]  ;;  %v215_v61 = vld [vmem:[#allocation2 + $0x3d8] sm:$0xff] }
  0x45   :  { %v219_v62 = vld [vmem:[#allocation2 + $0x3f8] sm:$0xff]  ;;  %v3993_v2 = vcombine.high %v214_v59, %v218_v60  ;;  %v3992_v10 = vcombine.low %v214_v59, %v218_v60  ;;  %v139_v59 = vld [vmem:[#allocation2 + $0x188] sm:$0xff] }
  0x46   :  { %v3995_v3 = vcombine.high %v215_v61, %v219_v62  ;;  %v3994_v11 = vcombine.low %v215_v61, %v219_v62  ;;  %v143_v60 = vld [vmem:[#allocation2 + $0x1a8] sm:$0xff]  ;;  %v146_v62 = vld [vmem:[#allocation2 + $0x1c0] sm:$0xff] }
  0x47   :  { %555 = vmatpush1.bf16.msra.mxu0 %v3988_v4  ;;  %598 = vmatpush1.bf16.msra.mxu1 %v3990_v7  ;;  %v90_v4 = vld [vmem:[#allocation2] sm:$0xff] }
  0x48   :  { %626 = vmatprep.subr.bf16.mxu0 %v3937_v8  ;;  %669 = vmatprep.subr.bf16.mxu1 %v3939_v9  ;;  %v94_v7 = vld [vmem:[#allocation2 + $0x20] sm:$0xff]  ;;  %v91_v8 = vld [vmem:[#allocation2 + $0x8] sm:$0xff] }
  0x49   :  { %v95_v9 = vld [vmem:[#allocation2 + $0x28] sm:$0xff]  ;;  %v3997_v13 = vcombine.high %v90_v4, %v94_v7  ;;  %v3996_v19 = vcombine.low %v90_v4, %v94_v7  ;;  %v82_v7 = vrot.slane %v4954_v5, 7 }
  0x4a   :  { %573 = vmatmul.mubr.bf16.vlgmr.msra.gmra.mrb[0].mxu0 %v4963_v12  ;;  %616 = vmatmul.mubr.bf16.vlgmr.msra.gmra.mrb[0].mxu1 %v4963_v12  ;;  %v3999_v14 = vcombine.high %v91_v8, %v95_v9  ;;  %v3998_v22 = vcombine.low %v91_v8, %v95_v9  ;;  %v4047_v8 = vcombine.high %v139_v59, %v143_v60  ;;  %v147_v9 = vld [vmem:[#allocation2 + $0x1c8] sm:$0xff] }
  0x4b   :  { %627 = vmatpush1.bf16.msra.mxu0 %v3936_v15  ;;  %670 = vmatpush1.bf16.msra.mxu1 %v3938_v16  ;;  %v98_v15 = vld [vmem:[#allocation2 + $0x40] sm:$0xff] }
  0x4c   :  { %628 = vmatprep.subr.bf16.mxu0 %v3945_v17  ;;  %671 = vmatprep.subr.bf16.mxu1 %v3947_v18  ;;  %v102_v16 = vld [vmem:[#allocation2 + $0x60] sm:$0xff]  ;;  %v99_v17 = vld [vmem:[#allocation2 + $0x48] sm:$0xff] }
  0x4d   :  { %658 = vmatprep.mubr.bf16.mxu0 %v4893_v0  ;;  %701 = vmatprep.mubr.bf16.mxu1 %v4893_v0  ;;  %v103_v18 = vld [vmem:[#allocation2 + $0x68] sm:$0xff]  ;;  %v4004_v27 = vcombine.low %v98_v15, %v102_v16 }
  0x4e   :  { %v4006_v29 = vcombine.low %v99_v17, %v103_v18 }
  0x4f   :  { %629 = vmatpush1.bf16.msra.mxu0 %v3944_v23  ;;  %672 = vmatpush1.bf16.msra.mxu1 %v3946_v24  ;;  %v4005_v23 = vcombine.high %v98_v15, %v102_v16  ;;  %v107_v24 = vld [vmem:[#allocation2 + $0x88] sm:$0xff]  ;;  %v92_v15 = vld [vmem:[#allocation2 + $0x10] sm:$0xff] }
  0x50   :  { %630 = vmatprep.subr.bf16.mxu0 %v3953_v25  ;;  %673 = vmatprep.subr.bf16.mxu1 %v3955_v26  ;;  %v111_v25 = vld [vmem:[#allocation2 + $0xa8] sm:$0xff]  ;;  %v4007_v26 = vcombine.high %v99_v17, %v103_v18  ;;  %v96_v16 = vld [vmem:[#allocation2 + $0x30] sm:$0xff]  ;;  %v1205_v17 = vrot.slane %v4959_v6, 1  ;;  %v4046_v18 = vcombine.low %v139_v59, %v143_v60 }
  0x51   :  { %v4014_v37 = vcombine.low %v107_v24, %v111_v25 }
  0x53   :  { %631 = vmatpush1.bf16.msra.mxu0 %v3952_v31  ;;  %674 = vmatpush1.bf16.msra.mxu1 %v3954_v32  ;;  %v118_v31 = vld [vmem:[#allocation2 + $0xe0] sm:$0xff]  ;;  %v4015_v32 = vcombine.high %v107_v24, %v111_v25 }
  0x54   :  { %632 = vmatprep.subr.bf16.mxu0 %v3961_v33  ;;  %675 = vmatprep.subr.bf16.mxu1 %v3963_v34  ;;  %v115_v33 = vld [vmem:[#allocation2 + $0xc8] sm:$0xff]  ;;  %v4021_v38 = vcombine.high %v114_v28, %v118_v31  ;;  %v4020_v43 = vcombine.low %v114_v28, %v118_v31  ;;  %v100_v28 = vld [vmem:[#allocation2 + $0x50] sm:$0xff]  ;;  %v4001_v31 = vcombine.high %v92_v15, %v96_v16 }
  0x55   :  { %v119_v34 = vld [vmem:[#allocation2 + $0xe8] sm:$0xff] }
  0x56   :  { %v4022_v46 = vcombine.low %v115_v33, %v119_v34 }
  0x57   :  { %633 = vmatpush1.bf16.msra.mxu0 %v3960_v39  ;;  %676 = vmatpush1.bf16.msra.mxu1 %v3962_v40  ;;  %v126_v39 = vld [vmem:[#allocation2 + $0x120] sm:$0xff]  ;;  %v4023_v40 = vcombine.high %v115_v33, %v119_v34  ;;  %v105_v33 = vld [vmem:[#allocation2 + $0x78] sm:$0xff]  ;;  %v4003_v34 = vcombine.high %v93_v20, %v97_v21 }
  0x58   :  { %634 = vmatprep.subr.bf16.mxu0 %v3969_v41  ;;  %677 = vmatprep.subr.bf16.mxu1 %v3971_v42  ;;  %v123_v41 = vld [vmem:[#allocation2 + $0x108] sm:$0xff]  ;;  %v4028_v52 = vcombine.low %v122_v36, %v126_v39 }
  0x59   :  { %v127_v42 = vld [vmem:[#allocation2 + $0x128] sm:$0xff] }
  0x5b   :  { %635 = vmatpush1.bf16.msra.mxu0 %v3968_v47  ;;  %678 = vmatpush1.bf16.msra.mxu1 %v3970_v48  ;;  %v4029_v47 = vcombine.high %v122_v36, %v126_v39  ;;  %v134_v48 = vld [vmem:[#allocation2 + $0x160] sm:$0xff]  ;;  %v4000_v36 = vcombine.low %v92_v15, %v96_v16  ;;  %v141_v16 = vld [vmem:[#allocation2 + $0x198] sm:$0xff] }
  0x5c   :  { %636 = vmatprep.subr.bf16.mxu0 %v3977_v49  ;;  %679 = vmatprep.subr.bf16.mxu1 %v3979_v50  ;;  %v4031_v49 = vcombine.high %v123_v41, %v127_v42  ;;  %v131_v50 = vld [vmem:[#allocation2 + $0x148] sm:$0xff]  ;;  %v4036_v61 = vcombine.low %v130_v44, %v134_v48 }
  0x5f   :  { %637 = vmatpush1.bf16.msra.mxu0 %v3976_v55  ;;  %680 = vmatpush1.bf16.msra.mxu1 %v3978_v56  ;;  %v4030_v55 = vcombine.low %v123_v41, %v127_v42  ;;  %v4037_v56 = vcombine.high %v130_v44, %v134_v48  ;;  %v113_v41 = vld [vmem:[#allocation2 + $0xb8] sm:$0xff]  ;;  %v116_v44 = vld [vmem:[#allocation2 + $0xd0] sm:$0xff] }
  0x60   :  { %638 = vmatprep.subr.bf16.mxu0 %v3985_v57  ;;  %681 = vmatprep.subr.bf16.mxu1 %v3987_v58  ;;  %v142_v57 = vld [vmem:[#allocation2 + $0x1a0] sm:$0xff]  ;;  %v4039_v58 = vcombine.high %v131_v50, %v135_v51 }
  0x63   :  { %639 = vmatpush1.bf16.msra.mxu0 %v3984_v63  ;;  %682 = vmatpush1.bf16.msra.mxu1 %v3986_v1  ;;  %v4038_v1 = vcombine.low %v131_v50, %v135_v51  ;;  %v121_v50 = vld [vmem:[#allocation2 + $0xf8] sm:$0xff] }
  0x64   :  { %640 = vmatprep.subr.bf16.mxu0 %v3993_v2  ;;  %683 = vmatprep.subr.bf16.mxu1 %v3995_v3  ;;  %v4045_v2 = vcombine.high %v138_v53, %v142_v57  ;;  %v150_v3 = vld [vmem:[#allocation2 + $0x1e0] sm:$0xff] }
  0x65   :  { %v4052_v25 = vcombine.low %v146_v62, %v150_v3 }
  0x67   :  { %641 = vmatpush1.bf16.msra.mxu0 %v3992_v10  ;;  %684 = vmatpush1.bf16.msra.mxu1 %v3994_v11  ;;  %v83_v10 = vrot.slane %v4959_v6, 7  ;;  %v151_v11 = vld [vmem:[#allocation2 + $0x1e8] sm:$0xff] }
  0x68   :  { %1032 = vmatprep.subr.bf16.mxu0 %v3997_v13  ;;  %1075 = vmatprep.subr.bf16.mxu1 %v3999_v14  ;;  %v1204_v13 = vrot.slane %v4954_v5, 1  ;;  %v4044_v14 = vcombine.low %v138_v53, %v142_v57  ;;  %v4055_v24 = vcombine.high %v147_v9, %v151_v11  ;;  %v124_v53 = vld [vmem:[#allocation2 + $0x110] sm:$0xff]  ;;  %v125_v57 = vld [vmem:[#allocation2 + $0x118] sm:$0xff] }
  0x69   :  { %v1231_v5 = vld [vmem:[#allocation2 + $0x490] sm:$0xff] }
  0x6a   :  { %659 = vmatmul.mubr.bf16.vlgmr.msra.gmra.mrb[4].mxu0 %v4963_v12  ;;  %702 = vmatmul.mubr.bf16.vlgmr.msra.gmra.mrb[4].mxu1 %v4963_v12  ;;  %v51_v12 = vlaneseq }
  0x6b   :  { %1033 = vmatpush1.bf16.msra.mxu0 %v3996_v19  ;;  %1076 = vmatpush1.bf16.msra.mxu1 %v3998_v22  ;;  %v4053_v19 = vcombine.high %v146_v62, %v150_v3  ;;  %v136_v62 = vld [vmem:[#allocation2 + $0x170] sm:$0xff]  ;;  %v133_v3 = vld [vmem:[#allocation2 + $0x158] sm:$0xff]  ;;  %v1245_v22 = vld [vmem:[#allocation2 + $0x500] sm:$0xff] }
  0x6c   :  { %1034 = vmatprep.subr.bf16.mxu0 %v4005_v23  ;;  %1077 = vmatprep.subr.bf16.mxu1 %v4007_v26  ;;  %v4973_v45 = vshrl.u32 %v51_v12, 7  ;;  %v108_v12 = vld [vmem:[#allocation2 + $0x90] sm:$0xff] }
  0x6d   :  { %1064 = vmatprep.mubr.bf16.mxu0 %v4893_v0  ;;  %1107 = vmatprep.mubr.bf16.mxu1 %v4893_v0 }
  0x6e   :  { %v58_v54 = vand.u32 15, %v4973_v45  ;;  %vm84_vm0 = vcmp.lt.s32.totalorder %v4973_v45, 1  ;;  %v4982_v4 = vadd.s32 8, %v4973_v45  ;;  %vm1206_vm5 = vcmp.lt.s32.totalorder %v4973_v45, 7 }
  0x6f   :  { %1035 = vmatpush1.bf16.msra.mxu0 %v4004_v27  ;;  %1078 = vmatpush1.bf16.msra.mxu1 %v4006_v29  ;;  %v85_v26 = vsel %vm84_vm0, %v82_v7, %v83_v10  ;;  %v86_v27 = vsel %vm84_vm0, %v83_v10, %v82_v7  ;;  %v104_v29 = vld [vmem:[#allocation2 + $0x70] sm:$0xff]  ;;  %v137_v7 = vld [vmem:[#allocation2 + $0x178] sm:$0xff] }
  0x70   :  { %1036 = vmatprep.subr.bf16.mxu0 %v4013_v30  ;;  %1079 = vmatprep.subr.bf16.mxu1 %v4015_v32  ;;  %vm4977_vm1 = vcmp.ne.s32.totalorder %v58_v54, 0  ;;  %v65_v23 = vand.u32 15, %v4982_v4  ;;  %v4054_v30 = vcombine.low %v147_v9, %v151_v11  ;;  %v101_v32 = vld [vmem:[#allocation2 + $0x58] sm:$0xff]  ;;  %v4009_v39 = vcombine.high %v100_v28, %v104_v29  ;;  %v128_v54 = vld [vmem:[#allocation2 + $0x130] sm:$0xff] }
  0x71   :  { %vm4991_vm3 = vmpackc.low %vm4894_vm2, %vm4977_vm1  ;;  %v4011_v42 = vcombine.high %v101_v32, %v105_v33  ;;  %v4032_v9 = vcombine.low %v124_v53, %v128_v54  ;;  %v140_v10 = vld [vmem:[#allocation2 + $0x190] sm:$0xff] }
  0x72   :  { %v144_v11 = vld [vmem:[#allocation2 + $0x1b0] sm:$0xff]  ;;  %vm5020_vm4 = vcmp.ne.s32.totalorder %v65_v23, 15 }
  0x73   :  { %1037 = vmatpush1.bf16.msra.mxu0 %v4012_v35  ;;  %1080 = vmatpush1.bf16.msra.mxu1 %v4014_v37  ;;  %v5000_v35 = vpack.c.bf16 %v85_v26, %v86_v27  ;;  %v112_v37 = vld [vmem:[#allocation2 + $0xb0] sm:$0xff]  ;;  %v4049_v26 = vcombine.high %v140_v10, %v144_v11  ;;  %v149_v27 = vld [vmem:[#allocation2 + $0x1d8] sm:$0xff]  ;;  %vm5028_vm6 = vmpackc.low %vm5020_vm4, %vm4894_vm2 }
  0x74   :  { %1038 = vmatprep.subr.bf16.mxu0 %v4021_v38  ;;  %1081 = vmatprep.subr.bf16.mxu1 %v4023_v40  ;;  %v4002_v38 = vcombine.low %v93_v20, %v97_v21  ;;  %v109_v40 = vld [vmem:[#allocation2 + $0x98] sm:$0xff]  ;;  %v4017_v48 = vcombine.high %v108_v12, %v112_v37  ;;  %v148_v21 = vld [vmem:[#allocation2 + $0x1d0] sm:$0xff] }
  0x75   :  { %v4019_v51 = vcombine.high %v109_v40, %v113_v41 }
  0x77   :  { %1039 = vmatpush1.bf16.msra.mxu0 %v4020_v43  ;;  %1082 = vmatpush1.bf16.msra.mxu1 %v4022_v46  ;;  %v4008_v43 = vcombine.low %v100_v28, %v104_v29  ;;  %v120_v46 = vld [vmem:[#allocation2 + $0xf0] sm:$0xff]  ;;  %v153_v28 = vld [vmem:[#allocation2 + $0x1f8] sm:$0xff] }
  0x78   :  { %1040 = vmatprep.subr.bf16.mxu0 %v4029_v47  ;;  %1083 = vmatprep.subr.bf16.mxu1 %v4031_v49  ;;  %v4010_v47 = vcombine.low %v101_v32, %v105_v33  ;;  %v117_v49 = vld [vmem:[#allocation2 + $0xd8] sm:$0xff]  ;;  %v4024_v60 = vcombine.low %v116_v44, %v120_v46  ;;  %v1217_v32 = vld [vmem:[#allocation2 + $0x420] sm:$0xff] }
  0x79   :  { %v4027_v59 = vcombine.high %v117_v49, %v121_v50 }
  0x7b   :  { %1041 = vmatpush1.bf16.msra.mxu0 %v4028_v52  ;;  %1084 = vmatpush1.bf16.msra.mxu1 %v4030_v55  ;;  %v4016_v52 = vcombine.low %v108_v12, %v112_v37  ;;  %v4018_v55 = vcombine.low %v109_v40, %v113_v41  ;;  %v1218_v12 = vld [vmem:[#allocation2 + $0x428] sm:$0xff]  ;;  %v4059_v37 = vcombine.high %v149_v27, %v153_v28  ;;  %v1225_v40 = vld [vmem:[#allocation2 + $0x460] sm:$0xff] }
  0x7c   :  { %1042 = vmatprep.subr.bf16.mxu0 %v4037_v56  ;;  %1085 = vmatprep.subr.bf16.mxu1 %v4039_v58  ;;  %v4025_v56 = vcombine.high %v116_v44, %v120_v46  ;;  %v129_v58 = vld [vmem:[#allocation2 + $0x138] sm:$0xff]  ;;  %v4058_v41 = vcombine.low %v149_v27, %v153_v28  ;;  %v1226_v44 = vld [vmem:[#allocation2 + $0x468] sm:$0xff] }
  0x7f   :  { %1043 = vmatpush1.bf16.msra.mxu0 %v4036_v61  ;;  %1086 = vmatpush1.bf16.msra.mxu1 %v4038_v1  ;;  %v132_v61 = vld [vmem:[#allocation2 + $0x150] sm:$0xff]  ;;  %v4026_v1 = vcombine.low %v117_v49, %v121_v50  ;;  %v1233_v49 = vld [vmem:[#allocation2 + $0x4a0] sm:$0xff] }
  0x80   :  { %1044 = vmatprep.subr.bf16.mxu0 %v4045_v2  ;;  %1087 = vmatprep.subr.bf16.mxu1 %v4047_v8  ;;  %v4033_v2 = vcombine.high %v124_v53, %v128_v54  ;;  %v4035_v8 = vcombine.high %v125_v57, %v129_v58  ;;  %v4041_v15 = vcombine.high %v132_v61, %v136_v62  ;;  %v1234_v53 = vld [vmem:[#allocation2 + $0x4a8] sm:$0xff] }
  0x81   :  { %v4040_v20 = vcombine.low %v132_v61, %v136_v62  ;;  %v1242_v61 = vld [vmem:[#allocation2 + $0x4e8] sm:$0xff] }
  0x83   :  { %1045 = vmatpush1.bf16.msra.mxu0 %v4044_v14  ;;  %1088 = vmatpush1.bf16.msra.mxu1 %v4046_v18  ;;  %v4034_v14 = vcombine.low %v125_v57, %v129_v58  ;;  %v145_v18 = vld [vmem:[#allocation2 + $0x1b8] sm:$0xff]  ;;  %v1241_v57 = vld [vmem:[#allocation2 + $0x4e0] sm:$0xff] }
  0x84   :  { %1046 = vmatprep.subr.bf16.mxu0 %v4053_v19  ;;  %1089 = vmatprep.subr.bf16.mxu1 %v4055_v24  ;;  %v4043_v19 = vcombine.high %v133_v3, %v137_v7  ;;  %v152_v24 = vld [vmem:[#allocation2 + $0x1f0] sm:$0xff]  ;;  %v4051_v29 = vcombine.high %v141_v16, %v145_v18  ;;  %v4050_v33 = vcombine.low %v141_v16, %v145_v18  ;;  %v1254_v18 = vld [vmem:[#allocation2 + $0x548] sm:$0xff] }
  0x87   :  { %1047 = vmatpush1.bf16.msra.mxu0 %v4052_v25  ;;  %1090 = vmatpush1.bf16.msra.mxu1 %v4054_v30  ;;  %v4042_v25 = vcombine.low %v133_v3, %v137_v7  ;;  %v4048_v30 = vcombine.low %v140_v10, %v144_v11  ;;  %v1246_v7 = vld [vmem:[#allocation2 + $0x508] sm:$0xff]  ;;  %v1253_v11 = vld [vmem:[#allocation2 + $0x540] sm:$0xff] }
  0x88   :  { %1118 = vmatprep.subr.bf16.mxu0 %v4001_v31  ;;  %1161 = vmatprep.subr.bf16.mxu1 %v4003_v34  ;;  %v1213_v31 = vld [vmem:[#allocation2 + $0x400] sm:$0xff]  ;;  %v4057_v34 = vcombine.high %v148_v21, %v152_v24 }
  0x8a   :  { %4062 = vmatmul.mubr.msk.bf16.vlgmr.msra.gmra.mrb[0].mxu0 %vm4991_vm3, %v5000_v35  ;;  %4065 = vmatmul.mubr.msk.bf16.vlgmr.msra.gmra.mrb[0].mxu1 %vm4991_vm3, %v5000_v35 }
  0x8b   :  { %1119 = vmatpush1.bf16.msra.mxu0 %v4000_v36  ;;  %1162 = vmatpush1.bf16.msra.mxu1 %v4002_v38  ;;  %v1214_v36 = vld [vmem:[#allocation2 + $0x408] sm:$0xff]  ;;  %v4056_v38 = vcombine.low %v148_v21, %v152_v24 }
  0x8c   :  { %1120 = vmatprep.subr.bf16.mxu0 %v4009_v39  ;;  %1163 = vmatprep.subr.bf16.mxu1 %v4011_v42  ;;  %v1221_v39 = vld [vmem:[#allocation2 + $0x440] sm:$0xff]  ;;  %v4073_v42 = vcombine.high %v1213_v31, %v1217_v32  ;;  %v4075_v46 = vcombine.high %v1214_v36, %v1218_v12  ;;  %v4074_v50 = vcombine.low %v1214_v36, %v1218_v12  ;;  %v1270_v36 = vld [vmem:[#allocation2 + $0x5c8] sm:$0xff] }
  0x8d   :  { %1150 = vmatprep.mubr.bf16.mxu0 %v4893_v0  ;;  %1193 = vmatprep.mubr.bf16.mxu1 %v4893_v0  ;;  %v1274_v12 = vld [vmem:[#allocation2 + $0x5e8] sm:$0xff] }
  0x8f   :  { %1121 = vmatpush1.bf16.msra.mxu0 %v4008_v43  ;;  %1164 = vmatpush1.bf16.msra.mxu1 %v4010_v47  ;;  %v1222_v43 = vld [vmem:[#allocation2 + $0x448] sm:$0xff]  ;;  %v4072_v47 = vcombine.low %v1213_v31, %v1217_v32  ;;  %v1269_v31 = vld [vmem:[#allocation2 + $0x5c0] sm:$0xff] }
  0x90   :  { %1122 = vmatprep.subr.bf16.mxu0 %v4017_v48  ;;  %1165 = vmatprep.subr.bf16.mxu1 %v4019_v51  ;;  %v1229_v48 = vld [vmem:[#allocation2 + $0x480] sm:$0xff]  ;;  %v4081_v51 = vcombine.high %v1221_v39, %v1225_v40  ;;  %v4083_v54 = vcombine.high %v1222_v43, %v1226_v44  ;;  %v4082_v58 = vcombine.low %v1222_v43, %v1226_v44  ;;  %v1216_v44 = vld [vmem:[#allocation2 + $0x418] sm:$0xff] }
  0x91   :  { %v1273_v32 = vld [vmem:[#allocation2 + $0x5e0] sm:$0xff] }
  0x92   :  { %v4129_v43 = vcombine.high %v1269_v31, %v1273_v32 }
  0x93   :  { %1123 = vmatpush1.bf16.msra.mxu0 %v4016_v52  ;;  %1166 = vmatpush1.bf16.msra.mxu1 %v4018_v55  ;;  %v1230_v52 = vld [vmem:[#allocation2 + $0x488] sm:$0xff]  ;;  %v4080_v55 = vcombine.low %v1221_v39, %v1225_v40  ;;  %v1215_v40 = vld [vmem:[#allocation2 + $0x410] sm:$0xff]  ;;  %v4661_v39 = vld [vmem:[#allocation4 + $0x60] sm:$0xff]  }
  0x94   :  { %1124 = vmatprep.subr.bf16.mxu0 %v4025_v56  ;;  %1167 = vmatprep.subr.bf16.mxu1 %v4027_v59  ;;  %v1237_v56 = vld [vmem:[#allocation2 + $0x4c0] sm:$0xff]  ;;  %v4089_v59 = vcombine.high %v1229_v48, %v1233_v49  ;;  %v4091_v62 = vcombine.high %v1230_v52, %v1234_v53 }
  0x95   :  { %v4097_v3 = vcombine.high %v1237_v56, %v1241_v57  ;;  %v4096_v10 = vcombine.low %v1237_v56, %v1241_v57  ;;  %v1228_v56 = vld [vmem:[#allocation2 + $0x478] sm:$0xff] }
  0x97   :  { %1125 = vmatpush1.bf16.msra.mxu0 %v4024_v60  ;;  %1168 = vmatpush1.bf16.msra.mxu1 %v4026_v1  ;;  %v1238_v60 = vld [vmem:[#allocation2 + $0x4c8] sm:$0xff]  ;;  %v4088_v1 = vcombine.low %v1229_v48, %v1233_v49  ;;  %v4128_v48 = vcombine.low %v1269_v31, %v1273_v32  ;;  %v1207_v49 = vsel %vm1206_vm5, %v1204_v13, %v1205_v17  ;;  %v1267_v31 = vld [vmem:[#allocation2 + $0x5b0] sm:$0xff] }
  0x98   :  { %1126 = vmatprep.subr.bf16.mxu0 %v4033_v2  ;;  %1169 = vmatprep.subr.bf16.mxu1 %v4035_v8  ;;  %v4090_v2 = vcombine.low %v1230_v52, %v1234_v53  ;;  %v1250_v8 = vld [vmem:[#allocation2 + $0x528] sm:$0xff]  ;;  %v1227_v52 = vld [vmem:[#allocation2 + $0x470] sm:$0xff]  ;;  %v4130_v53 = vcombine.low %v1270_v36, %v1274_v12 }
  0x99   :  { %v4107_v21 = vcombine.high %v1246_v7, %v1250_v8  ;;  %v4106_v27 = vcombine.low %v1246_v7, %v1250_v8  ;;  %v1240_v7 = vld [vmem:[#allocation2 + $0x4d8] sm:$0xff] }
  0x9a   :  { %v1244_v8 = vld [vmem:[#allocation2 + $0x4f8] sm:$0xff] }
  0x9b   :  { %1127 = vmatpush1.bf16.msra.mxu0 %v4032_v9  ;;  %1170 = vmatpush1.bf16.msra.mxu1 %v4034_v14  ;;  %v4099_v9 = vcombine.high %v1238_v60, %v1242_v61  ;;  %v1257_v14 = vld [vmem:[#allocation2 + $0x560] sm:$0xff] }
  0x9c   :  { %1128 = vmatprep.subr.bf16.mxu0 %v4041_v15  ;;  %1171 = vmatprep.subr.bf16.mxu1 %v4043_v19  ;;  %v4098_v15 = vcombine.low %v1238_v60, %v1242_v61  ;;  %v1258_v19 = vld [vmem:[#allocation2 + $0x568] sm:$0xff]  ;;  %v4113_v28 = vcombine.high %v1253_v11, %v1257_v14  ;;  %v4112_v23 = vcombine.low %v1253_v11, %v1257_v14  ;;  %v1235_v60 = vld [vmem:[#allocation2 + $0x4b0] sm:$0xff]  ;;  %v1236_v61 = vld [vmem:[#allocation2 + $0x4b8] sm:$0xff] }
  0x9d   :  { %v4115_v4 = vcombine.high %v1254_v18, %v1258_v19  ;;  %v1247_v11 = vld [vmem:[#allocation2 + $0x510] sm:$0xff] }
  0x9e   :  { %v1251_v14 = vld [vmem:[#allocation2 + $0x530] sm:$0xff] }
  0x9f   :  { %1129 = vmatpush1.bf16.msra.mxu0 %v4040_v20  ;;  %1172 = vmatpush1.bf16.msra.mxu1 %v4042_v25  ;;  %v1261_v25 = vld [vmem:[#allocation2 + $0x580] sm:$0xff] }
  0xa0   :  { %1130 = vmatprep.subr.bf16.mxu0 %v4049_v26  ;;  %1173 = vmatprep.subr.bf16.mxu1 %v4051_v29  ;;  %v1265_v26 = vld [vmem:[#allocation2 + $0x5a0] sm:$0xff]  ;;  %v1262_v29 = vld [vmem:[#allocation2 + $0x588] sm:$0xff] }
  0xa3   :  { %1131 = vmatpush1.bf16.msra.mxu0 %v4048_v30  ;;  %1174 = vmatpush1.bf16.msra.mxu1 %v4050_v33  ;;  %v1266_v30 = vld [vmem:[#allocation2 + $0x5a8] sm:$0xff]  ;;  %v4114_v33 = vcombine.low %v1254_v18, %v1258_v19  ;;  %v1248_v18 = vld [vmem:[#allocation2 + $0x518] sm:$0xff] }
  0xa4   :  { %1132 = vmatprep.subr.bf16.mxu0 %v4057_v34  ;;  %1175 = vmatprep.subr.bf16.mxu1 %v4059_v37  ;;  %v4121_v34 = vcombine.high %v1261_v25, %v1265_v26  ;;  %v4123_v37 = vcombine.high %v1262_v29, %v1266_v30  ;;  %v1252_v19 = vld [vmem:[#allocation2 + $0x538] sm:$0xff] }
  0xa5   :  { %v4110_v32 = vcombine.low %v1248_v18, %v1252_v19 }
  0xa7   :  { %1133 = vmatpush1.bf16.msra.mxu0 %v4056_v38  ;;  %1176 = vmatpush1.bf16.msra.mxu1 %v4058_v41  ;;  %v4120_v38 = vcombine.low %v1261_v25, %v1265_v26  ;;  %v1219_v41 = vld [vmem:[#allocation2 + $0x430] sm:$0xff] }
  0xa8   :  { %1597 = vmatprep.subr.bf16.mxu0 %v4073_v42  ;;  %1640 = vmatprep.subr.bf16.mxu1 %v4075_v46  ;;  %v4122_v42 = vcombine.low %v1262_v29, %v1266_v30  ;;  %v1220_v46 = vld [vmem:[#allocation2 + $0x438] sm:$0xff]  ;;  %v1255_v25 = vld [vmem:[#allocation2 + $0x550] sm:$0xff]  ;;  %v4111_v30 = vcombine.high %v1248_v18, %v1252_v19 }
  0xa9   :  { %v4079_v57 = vcombine.high %v1216_v44, %v1220_v46  ;;  %v4078_v6 = vcombine.low %v1216_v44, %v1220_v46  ;;  %v1259_v26 = vld [vmem:[#allocation2 + $0x570] sm:$0xff]  ;;  %v1260_v29 = vld [vmem:[#allocation2 + $0x578] sm:$0xff] }
  0xaa   :  { %4068 = vmatmul.mubr.msk.bf16.vlgmr.msra.gmra.mrb[4].mxu0 %vm4991_vm3, %v5000_v35  ;;  %4071 = vmatmul.mubr.msk.bf16.vlgmr.msra.gmra.mrb[4].mxu1 %vm4991_vm3, %v5000_v35  ;;  %v1249_v35 = vld [vmem:[#allocation2 + $0x520] sm:$0xff]  ;;  %v1276_v44 = vld [vmem:[#allocation2 + $0x5f8] sm:$0xff] }
  0xab   :  { %1598 = vmatpush1.bf16.msra.mxu0 %v4072_v47  ;;  %1641 = vmatpush1.bf16.msra.mxu1 %v4074_v50  ;;  %v4105_v16 = vcombine.high %v1245_v22, %v1249_v35  ;;  %v4104_v24 = vcombine.low %v1245_v22, %v1249_v35  ;;  %v4131_v47 = vcombine.high %v1270_v36, %v1274_v12  ;;  %v1239_v22 = vld [vmem:[#allocation2 + $0x4d0] sm:$0xff]  ;;  %v1268_v36 = vld [vmem:[#allocation2 + $0x5b8] sm:$0xff] }
  0xac   :  { %1599 = vmatprep.subr.bf16.mxu0 %v4081_v51  ;;  %1642 = vmatprep.subr.bf16.mxu1 %v4083_v54  ;;  %v1208_v50 = vsel %vm1206_vm5, %v1205_v17, %v1204_v13  ;;  %v1223_v51 = vld [vmem:[#allocation2 + $0x450] sm:$0xff]  ;;  %v4077_v54 = vcombine.high %v1215_v40, %v1219_v41  ;;  %v1232_v17 = vld [vmem:[#allocation2 + $0x498] sm:$0xff] }
  0xad   :  { %1629 = vmatprep.mubr.bf16.mxu0 %v4893_v0  ;;  %1672 = vmatprep.mubr.bf16.mxu1 %v4893_v0  ;;  %v4085_v13 = vcombine.high %v1223_v51, %v1227_v52  ;;  %v1243_v35 = vld [vmem:[#allocation2 + $0x4f0] sm:$0xff]  ;;  %v4673_v18 = vld [vmem:[#allocation4 + $0x78] sm:$0xff]  }
  0xae   :  { %v4674_v19 = vld [vmem:[#allocation4 + $0xf8] sm:$0xff]  }
  0xaf   :  { %1600 = vmatpush1.bf16.msra.mxu0 %v4080_v55  ;;  %1643 = vmatpush1.bf16.msra.mxu1 %v4082_v58  ;;  %v1224_v55 = vld [vmem:[#allocation2 + $0x458] sm:$0xff]  ;;  %v5044_v58 = vpack.c.bf16 %v1208_v50, %v1207_v49 }
  0xb0   :  { %1601 = vmatprep.subr.bf16.mxu0 %v4089_v59  ;;  %1644 = vmatprep.subr.bf16.mxu1 %v4091_v62  ;;  %v4076_v59 = vcombine.low %v1215_v40, %v1219_v41  ;;  %v4087_v62 = vcombine.high %v1224_v55, %v1228_v56  ;;  %v1275_v40 = vld [vmem:[#allocation2 + $0x5f0] sm:$0xff] }
  0xb3   :  { %1602 = vmatpush1.bf16.msra.mxu0 %v4088_v1  ;;  %1645 = vmatpush1.bf16.msra.mxu1 %v4090_v2  ;;  %v4084_v1 = vcombine.low %v1223_v51, %v1227_v52  ;;  %v4086_v2 = vcombine.low %v1224_v55, %v1228_v56  ;;  %v4645_v51 = vld [vmem:[#allocation4 + $0x40] sm:$0xff]  }
  0xb4   :  { %1603 = vmatprep.subr.bf16.mxu0 %v4097_v3  ;;  %1646 = vmatprep.subr.bf16.mxu1 %v4099_v9  ;;  %v4093_v3 = vcombine.high %v1231_v5, %v1235_v60  ;;  %v4095_v9 = vcombine.high %v1232_v17, %v1236_v61  ;;  %v4647_v55 = vld [vmem:[#allocation4] sm:$0xff]  }
  0xb5   :  { %v4648_v56 = vld [vmem:[#allocation4 + $0x80] sm:$0xff]  }
  0xb7   :  { %1604 = vmatpush1.bf16.msra.mxu0 %v4096_v10  ;;  %1647 = vmatpush1.bf16.msra.mxu1 %v4098_v15  ;;  %v4092_v10 = vcombine.low %v1231_v5, %v1235_v60  ;;  %v4094_v15 = vcombine.low %v1232_v17, %v1236_v61  ;;  %v4651_v5 = vld [vmem:[#allocation4 + $0x8] sm:$0xff]   ;;  %v4655_v17 = vld [vmem:[#allocation4 + $0x10] sm:$0xff]  }
  0xb8   :  { %1605 = vmatprep.subr.bf16.mxu0 %v4105_v16  ;;  %1648 = vmatprep.subr.bf16.mxu1 %v4107_v21  ;;  %v4101_v16 = vcombine.high %v1239_v22, %v1243_v35  ;;  %v4103_v21 = vcombine.high %v1240_v7, %v1244_v8  ;;  %v4652_v60 = vld [vmem:[#allocation4 + $0x88] sm:$0xff]   ;;  %v4656_v61 = vld [vmem:[#allocation4 + $0x90] sm:$0xff]  }
  0xbb   :  { %1606 = vmatpush1.bf16.msra.mxu0 %v4104_v24  ;;  %1649 = vmatpush1.bf16.msra.mxu1 %v4106_v27  ;;  %v4100_v24 = vcombine.low %v1239_v22, %v1243_v35  ;;  %v4102_v27 = vcombine.low %v1240_v7, %v1244_v8  ;;  %v4659_v22 = vld [vmem:[#allocation4 + $0x18] sm:$0xff]   ;;  %v4665_v7 = vld [vmem:[#allocation4 + $0x68] sm:$0xff]  }
  0xbc   :  { %1607 = vmatprep.subr.bf16.mxu0 %v4113_v28  ;;  %1650 = vmatprep.subr.bf16.mxu1 %v4115_v4  ;;  %v1256_v28 = vld [vmem:[#allocation2 + $0x558] sm:$0xff]  ;;  %v4108_v4 = vcombine.low %v1247_v11, %v1251_v14  ;;  %v4666_v8 = vld [vmem:[#allocation4 + $0xe8] sm:$0xff]  }
  0xbd   :  { %v4119_v12 = vcombine.high %v1256_v28, %v1260_v29  ;;  %v4118_v41 = vcombine.low %v1256_v28, %v1260_v29  ;;  %v4660_v35 = vld [vmem:[#allocation4 + $0x98] sm:$0xff]   ;;  %v1797_v28 = vsub.s32 2, %v4973_v45  ;;  %v1793_v29 = vsub.s32 1, %v4973_v45 }
  0xbf   :  { %1608 = vmatpush1.bf16.msra.mxu0 %v4112_v23  ;;  %1651 = vmatpush1.bf16.msra.mxu1 %v4114_v33  ;;  %v1263_v23 = vld [vmem:[#allocation2 + $0x590] sm:$0xff]  ;;  %v4117_v33 = vcombine.high %v1255_v25, %v1259_v26 }
  0xc0   :  { %1609 = vmatprep.subr.bf16.mxu0 %v4121_v34  ;;  %1652 = vmatprep.subr.bf16.mxu1 %v4123_v37  ;;  %v1264_v34 = vld [vmem:[#allocation2 + $0x598] sm:$0xff]  ;;  %v4116_v37 = vcombine.low %v1255_v25, %v1259_v26  ;;  %v4677_v25 = vld [vmem:[#allocation4 + $0x140] sm:$0xff]  }
  0xc1   :  { %v4127_v46 = vcombine.high %v1264_v34, %v1268_v36  ;;  %v4678_v26 = vld [vmem:[#allocation4 + $0x1c0] sm:$0xff]  }
  0xc3   :  { %1610 = vmatpush1.bf16.msra.mxu0 %v4120_v38  ;;  %1653 = vmatpush1.bf16.msra.mxu1 %v4122_v42  ;;  %v1271_v38 = vld [vmem:[#allocation2 + $0x5d0] sm:$0xff]  ;;  %v4125_v42 = vcombine.high %v1263_v23, %v1267_v31 }
  0xc4   :  { %1611 = vmatprep.subr.bf16.mxu0 %v4129_v43  ;;  %1654 = vmatprep.subr.bf16.mxu1 %v4131_v47  ;;  %v1272_v43 = vld [vmem:[#allocation2 + $0x5d8] sm:$0xff]  ;;  %v4124_v47 = vcombine.low %v1263_v23, %v1267_v31  ;;  %v4133_v49 = vcombine.high %v1271_v38, %v1275_v40  ;;  %v4132_v52 = vcombine.low %v1271_v38, %v1275_v40 }
  0xc5   :  { %v4135_v50 = vcombine.high %v1272_v43, %v1276_v44 }
  0xc7   :  { %1612 = vmatpush1.bf16.msra.mxu0 %v4128_v48  ;;  %1655 = vmatpush1.bf16.msra.mxu1 %v4130_v53  ;;  %v4126_v48 = vcombine.low %v1264_v34, %v1268_v36  ;;  %v4646_v53 = vld [vmem:[#allocation4 + $0xc0] sm:$0xff]  }
  0xc8   :  { %1683 = vmatprep.subr.bf16.mxu0 %v4077_v54  ;;  %1726 = vmatprep.subr.bf16.mxu1 %v4079_v57  ;;  %v4134_v54 = vcombine.low %v1272_v43, %v1276_v44  ;;  %v4649_v57 = vld [vmem:[#allocation4 + $0x48] sm:$0xff]  }
  0xca   :  { %4138 = vmatmul.mubr.msk.bf16.vlgmr.msra.gmra.mrb[0].mxu0 %vm5028_vm6, %v5044_v58  ;;  %4141 = vmatmul.mubr.msk.bf16.vlgmr.msra.gmra.mrb[0].mxu1 %vm5028_vm6, %v5044_v58 }
  0xcb   :  { %1684 = vmatpush1.bf16.msra.mxu0 %v4076_v59  ;;  %1727 = vmatpush1.bf16.msra.mxu1 %v4078_v6  ;;  %v4650_v59 = vld [vmem:[#allocation4 + $0xc8] sm:$0xff]   ;;  %v4653_v6 = vld [vmem:[#allocation4 + $0x50] sm:$0xff]  }
  0xcc   :  { %1685 = vmatprep.subr.bf16.mxu0 %v4085_v13  ;;  %1728 = vmatprep.subr.bf16.mxu1 %v4087_v62  ;;  %v4654_v13 = vld [vmem:[#allocation4 + $0xd0] sm:$0xff]   ;;  %v4657_v62 = vld [vmem:[#allocation4 + $0x58] sm:$0xff]  }
  0xcd   :  { %1715 = vmatprep.mubr.bf16.mxu0 %v4893_v0  ;;  %1758 = vmatprep.mubr.bf16.mxu1 %v4893_v0  ;;  %v4109_v0 = vcombine.high %v1247_v11, %v1251_v14  ;;  %v4669_v11 = vld [vmem:[#allocation4 + $0x70] sm:$0xff]  }
  0xce   :  { %v4670_v14 = vld [vmem:[#allocation4 + $0xf0] sm:$0xff]  }
  0xcf   :  { %1686 = vmatpush1.bf16.msra.mxu0 %v4084_v1  ;;  %1729 = vmatpush1.bf16.msra.mxu1 %v4086_v2  ;;  %v4658_v1 = vld [vmem:[#allocation4 + $0xd8] sm:$0xff]   ;;  %v4663_v2 = vld [vmem:[#allocation4 + $0x20] sm:$0xff]  }
  0xd0   :  { %1687 = vmatprep.subr.bf16.mxu0 %v4093_v3  ;;  %1730 = vmatprep.subr.bf16.mxu1 %v4095_v9  ;;  %v4664_v3 = vld [vmem:[#allocation4 + $0xa0] sm:$0xff]   ;;  %v4667_v9 = vld [vmem:[#allocation4 + $0x28] sm:$0xff]  }
  0xd3   :  { %1688 = vmatpush1.bf16.msra.mxu0 %v4092_v10  ;;  %1731 = vmatpush1.bf16.msra.mxu1 %v4094_v15  ;;  %v4668_v10 = vld [vmem:[#allocation4 + $0xa8] sm:$0xff]   ;;  %v4671_v15 = vld [vmem:[#allocation4 + $0x30] sm:$0xff]  }
  0xd4   :  { %1689 = vmatprep.subr.bf16.mxu0 %v4101_v16  ;;  %1732 = vmatprep.subr.bf16.mxu1 %v4103_v21  ;;  %v4672_v16 = vld [vmem:[#allocation4 + $0xb0] sm:$0xff]   ;;  %v4675_v21 = vld [vmem:[#allocation4 + $0x38] sm:$0xff]  }
  0xd7   :  { %1690 = vmatpush1.bf16.msra.mxu0 %v4100_v24  ;;  %1733 = vmatpush1.bf16.msra.mxu1 %v4102_v27  ;;  %v4676_v24 = vld [vmem:[#allocation4 + $0xb8] sm:$0xff]   ;;  %v1789_v27 = vsub.s32 0, %v4973_v45 }
  0xd8   :  { %1691 = vmatprep.subr.bf16.mxu0 %v4109_v0  ;;  %1734 = vmatprep.subr.bf16.mxu1 %v4111_v30  ;;  %v5064_v0 = vld [vmem:[%s5150_s2] sm:$0xff]  ;;  %v1801_v30 = vsub.s32 3, %v4973_v45 }
  0xd9   :  { %v1798_v23 = vrot.slane %v5064_v0, %v1797_v28  ;;  %v1794_v31 = vrot.slane %v5064_v0, %v1793_v29  ;;  %v4700_v28 = vld [vmem:[#allocation4 + $0x1a8] sm:$0xff]  }
  0xdb   :  { %1692 = vmatpush1.bf16.msra.mxu0 %v4108_v4  ;;  %1735 = vmatpush1.bf16.msra.mxu1 %v4110_v32  ;;  %v1790_v4 = vrot.slane %v5064_v0, %v1789_v27  ;;  %v1802_v32 = vrot.slane %v5064_v0, %v1801_v30  ;;  %v4699_v27 = vld [vmem:[#allocation4 + $0x128] sm:$0xff]   ;;  %v4701_v30 = vld [vmem:[#allocation4 + $0x170] sm:$0xff]  }
  0xdc   :  { %1693 = vmatprep.subr.bf16.mxu0 %v4117_v33  ;;  %1736 = vmatprep.subr.bf16.mxu1 %v4119_v12 }
  0xdf   :  { %1694 = vmatpush1.bf16.msra.mxu0 %v4116_v37  ;;  %1737 = vmatpush1.bf16.msra.mxu1 %v4118_v41 }
  0xe0   :  { %1695 = vmatprep.subr.bf16.mxu0 %v4125_v42  ;;  %1738 = vmatprep.subr.bf16.mxu1 %v4127_v46 }
  0xe3   :  { %1696 = vmatpush1.bf16.msra.mxu0 %v4124_v47  ;;  %1739 = vmatpush1.bf16.msra.mxu1 %v4126_v48 }
  0xe4   :  { %1697 = vmatprep.subr.bf16.mxu0 %v4133_v49  ;;  %1740 = vmatprep.subr.bf16.mxu1 %v4135_v50 }
  0xe7   :  { %1698 = vmatpush1.bf16.msra.mxu0 %v4132_v52  ;;  %1741 = vmatpush1.bf16.msra.mxu1 %v4134_v54 }
  0xe8   :  { %4341 = vmatprep.subr.bf16.mxu0 %v4645_v51  ;;  %4363 = vmatprep.subr.bf16.mxu1 %v4646_v53 }
  0xea   :  { %4144 = vmatmul.mubr.msk.bf16.vlgmr.msra.gmra.mrb[4].mxu0 %vm5028_vm6, %v5044_v58  ;;  %4147 = vmatmul.mubr.msk.bf16.vlgmr.msra.gmra.mrb[4].mxu1 %vm5028_vm6, %v5044_v58  ;;  %v4662_v58 = vld [vmem:[#allocation4 + $0xe0] sm:$0xff]  }
  0xeb   :  { %4342 = vmatpush3.bf16.msra.mxu0 %v4647_v55  ;;  %4364 = vmatpush3.bf16.msra.mxu1 %v4648_v56 }
  0xec   :  { %4343 = vmatprep.subr.bf16.mxu0 %v4649_v57  ;;  %4365 = vmatprep.subr.bf16.mxu1 %v4650_v59 }
  0xef   :  { %4344 = vmatpush3.bf16.msra.mxu0 %v4651_v5  ;;  %4366 = vmatpush3.bf16.msra.mxu1 %v4652_v60 }
  0xf0   :  { %4345 = vmatprep.subr.bf16.mxu0 %v4653_v6  ;;  %4367 = vmatprep.subr.bf16.mxu1 %v4654_v13  ;;  %v4679_v13 = vld [vmem:[#allocation4 + $0x100] sm:$0xff]  }
  0xf3   :  { %4346 = vmatpush3.bf16.msra.mxu0 %v4655_v17  ;;  %4368 = vmatpush3.bf16.msra.mxu1 %v4656_v61  ;;  %v4680_v61 = vld [vmem:[#allocation4 + $0x180] sm:$0xff]  }
  0xf4   :  { %4347 = vmatprep.subr.bf16.mxu0 %v4657_v62  ;;  %4369 = vmatprep.subr.bf16.mxu1 %v4658_v1  ;;  %v4681_v62 = vld [vmem:[#allocation4 + $0x148] sm:$0xff]  }
  0xf5   :  { %v4682_v1 = vld [vmem:[#allocation4 + $0x1c8] sm:$0xff]  }
  0xf7   :  { %4348 = vmatpush3.bf16.msra.mxu0 %v4659_v22  ;;  %4370 = vmatpush3.bf16.msra.mxu1 %v4660_v35  ;;  %v4683_v22 = vld [vmem:[#allocation4 + $0x108] sm:$0xff]  }
  0xf8   :  { %4349 = vmatprep.subr.bf16.mxu0 %v4661_v39  ;;  %4371 = vmatprep.subr.bf16.mxu1 %v4662_v58  ;;  %v4684_v35 = vld [vmem:[#allocation4 + $0x188] sm:$0xff]   ;;  %v4685_v39 = vld [vmem:[#allocation4 + $0x150] sm:$0xff]  }
  0xf9   :  { %v4686_v58 = vld [vmem:[#allocation4 + $0x1d0] sm:$0xff]  }
  0xfb   :  { %4350 = vmatpush3.bf16.msra.mxu0 %v4663_v2  ;;  %4372 = vmatpush3.bf16.msra.mxu1 %v4664_v3  ;;  %v4687_v2 = vld [vmem:[#allocation4 + $0x110] sm:$0xff]  }
  0xfc   :  { %4351 = vmatprep.subr.bf16.mxu0 %v4665_v7  ;;  %4373 = vmatprep.subr.bf16.mxu1 %v4666_v8  ;;  %v4688_v3 = vld [vmem:[#allocation4 + $0x190] sm:$0xff]   ;;  %v4689_v7 = vld [vmem:[#allocation4 + $0x158] sm:$0xff]  }
  0xfd   :  { %v4690_v8 = vld [vmem:[#allocation4 + $0x1d8] sm:$0xff]  }
  0xff   :  { %4352 = vmatpush3.bf16.msra.mxu0 %v4667_v9  ;;  %4374 = vmatpush3.bf16.msra.mxu1 %v4668_v10  ;;  %v4691_v9 = vld [vmem:[#allocation4 + $0x118] sm:$0xff]  }
 0x100   :  { %4353 = vmatprep.subr.bf16.mxu0 %v4669_v11  ;;  %4375 = vmatprep.subr.bf16.mxu1 %v4670_v14  ;;  %v4692_v10 = vld [vmem:[#allocation4 + $0x198] sm:$0xff]   ;;  %v4693_v11 = vld [vmem:[#allocation4 + $0x160] sm:$0xff]  }
 0x101   :  { %v4694_v14 = vld [vmem:[#allocation4 + $0x1e0] sm:$0xff]  }
 0x103   :  { %4354 = vmatpush3.bf16.msra.mxu0 %v4671_v15  ;;  %4376 = vmatpush3.bf16.msra.mxu1 %v4672_v16  ;;  %v4695_v15 = vld [vmem:[#allocation4 + $0x120] sm:$0xff]  }
 0x104   :  { %4355 = vmatprep.subr.bf16.mxu0 %v4673_v18  ;;  %4377 = vmatprep.subr.bf16.mxu1 %v4674_v19  ;;  %v4696_v16 = vld [vmem:[#allocation4 + $0x1a0] sm:$0xff]   ;;  %v4697_v18 = vld [vmem:[#allocation4 + $0x168] sm:$0xff]   ;;  %v1805_v19 = vsub.s32 4, %v4973_v45 }
 0x106   :  { %v1806_v29 = vrot.slane %v5064_v0, %v1805_v19  ;;  %v4719_v19 = vld [vmem:[#allocation4 + $0x210] sm:$0xff]  }
 0x107   :  { %4356 = vmatpush3.bf16.msra.mxu0 %v4675_v21  ;;  %4378 = vmatpush3.bf16.msra.mxu1 %v4676_v24  ;;  %v4698_v21 = vld [vmem:[#allocation4 + $0x1e8] sm:$0xff]   ;;  %v1813_v24 = vsub.s32 6, %v4973_v45 }
 0x108   :  { %4385 = vmatprep.subr.bf16.mxu0 %v4677_v25  ;;  %4407 = vmatprep.subr.bf16.mxu1 %v4678_v26  ;;  %v1809_v25 = vsub.s32 5, %v4973_v45  ;;  %v1817_v26 = vsub.s32 7, %v4973_v45 }
 0x19d   :  { %v1631_v33 = vpop.f32.mrb[0].mxu0  ;;  %v1674_v36 = vpop.f32.mrb[0].mxu1 }
 0x19e   :  { %v1827_v34 = vadd.f32 %v1790_v4, %v1631_v33  ;;  %v1633_v12 = vpop.f32.mrb[1].mxu0  ;;  %v1829_v37 = vadd.f32 %v1798_v23, %v1674_v36  ;;  %v1676_v40 = vpop.f32.mrb[1].mxu1 }
 0x19f   :  { %v1828_v38 = vadd.f32 %v1794_v31, %v1633_v12  ;;  %v1635_v41 = vpop.f32.mrb[2].mxu0  ;;  %v1830_v42 = vadd.f32 %v1802_v32, %v1676_v40  ;;  %v1678_v44 = vpop.f32.mrb[2].mxu1  ;;  %v4705_v40 = vld [vmem:[#allocation4 + $0x178] sm:$0xff]  }
 0x1a0   :  { %v1835_v43 = vadd.f32 %v1790_v4, %v1635_v41  ;;  %v1637_v46 = vpop.f32.mrb[3].mxu0  ;;  %v1837_v47 = vadd.f32 %v1798_v23, %v1678_v44  ;;  %v1680_v49 = vpop.f32.mrb[3].mxu1  ;;  %v1843_v50 = vmax.f32 %v1827_v34, 0.0  ;;  %v1845_v53 = vmax.f32 %v1829_v37, 0.0  ;;  %v4703_v34 = vld [vmem:[#allocation4 + $0x130] sm:$0xff]  }
 0x1a1   :  { %v1836_v48 = vadd.f32 %v1794_v31, %v1637_v46  ;;  %v1838_v52 = vadd.f32 %v1802_v32, %v1680_v49  ;;  %v1844_v54 = vmax.f32 %v1828_v38, 0.0  ;;  %v1846_v57 = vmax.f32 %v1830_v42, 0.0  ;;  %v4702_v31 = vld [vmem:[#allocation4 + $0x1f0] sm:$0xff]   ;;  %v4706_v46 = vld [vmem:[#allocation4 + $0x1f8] sm:$0xff]  }
 0x1a2   :  { %v1851_v51 = vmax.f32 %v1835_v43, 0.0  ;;  %v1853_v55 = vmax.f32 %v1837_v47, 0.0  ;;  %v1814_v4 = vrot.slane %v5064_v0, %v1813_v24  ;;  %v1810_v23 = vrot.slane %v5064_v0, %v1809_v25  ;;  %v4704_v38 = vld [vmem:[#allocation4 + $0x1b0] sm:$0xff]   ;;  %v4721_v24 = vld [vmem:[#allocation4 + $0x258] sm:$0xff]  }
 0x1a3   :  { %v1852_v56 = vmax.f32 %v1836_v48, 0.0  ;;  %v1854_v5 = vmax.f32 %v1838_v52, 0.0  ;;  %v1818_v32 = vrot.slane %v5064_v0, %v1817_v26  ;;  %v4722_v25 = vld [vmem:[#allocation4 + $0x2d8] sm:$0xff]  }
 0x1a4   :  { %v5073_v59 = vpack.c.bf16 %v1851_v51, %v1843_v50  ;;  %v5075_v60 = vpack.c.bf16 %v1853_v55, %v1845_v53  ;;  %v4707_v53 = vld [vmem:[#allocation4 + $0x138] sm:$0xff]  }
 0x1a5   :  { %v5077_v6 = vpack.c.bf16 %v1852_v56, %v1844_v54  ;;  %v5079_v17 = vpack.c.bf16 %v1854_v5, %v1846_v57  ;;  %v4708_v57 = vld [vmem:[#allocation4 + $0x1b8] sm:$0xff]   ;;  %v4709_v5 = vld [vmem:[#allocation4 + $0x240] sm:$0xff]  }
 0x1a6   :  { %v4723_v26 = vld [vmem:[#allocation4 + $0x218] sm:$0xff]  }
 0x1a7   :  { %2411 = vmatprep.mubr.bf16.mxu0 %v5077_v6  ;;  %2452 = vmatprep.mubr.bf16.mxu1 %v5079_v17 }
 0x1a8   :  { %2412 = vmatmul.mubr.bf16.vlgmr.msra.gmra.mrb[8].mxu0 %v5073_v59  ;;  %2453 = vmatmul.mubr.bf16.vlgmr.msra.gmra.mrb[8].mxu1 %v5075_v60 }
 0x1a9   :  { %4386 = vmatpush3.bf16.msra.mxu0 %v4679_v13  ;;  %4408 = vmatpush3.bf16.msra.mxu1 %v4680_v61 }
 0x1aa   :  { %4387 = vmatprep.subr.bf16.mxu0 %v4681_v62  ;;  %4409 = vmatprep.subr.bf16.mxu1 %v4682_v1 }
 0x1ad   :  { %4388 = vmatpush3.bf16.msra.mxu0 %v4683_v22  ;;  %4410 = vmatpush3.bf16.msra.mxu1 %v4684_v35  ;;  %v4710_v22 = vld [vmem:[#allocation4 + $0x2c0] sm:$0xff]  }
 0x1ae   :  { %4389 = vmatprep.subr.bf16.mxu0 %v4685_v39  ;;  %4411 = vmatprep.subr.bf16.mxu1 %v4686_v58 }
 0x1b1   :  { %4390 = vmatpush3.bf16.msra.mxu0 %v4687_v2  ;;  %4412 = vmatpush3.bf16.msra.mxu1 %v4688_v3 }
 0x1b2   :  { %4391 = vmatprep.subr.bf16.mxu0 %v4689_v7  ;;  %4413 = vmatprep.subr.bf16.mxu1 %v4690_v8  ;;  %v4711_v7 = vld [vmem:[#allocation4 + $0x200] sm:$0xff]  }
 0x1b5   :  { %4392 = vmatpush3.bf16.msra.mxu0 %v4691_v9  ;;  %4414 = vmatpush3.bf16.msra.mxu1 %v4692_v10  ;;  %v4712_v9 = vld [vmem:[#allocation4 + $0x280] sm:$0xff]   ;;  %v4713_v10 = vld [vmem:[#allocation4 + $0x248] sm:$0xff]  }
 0x1b6   :  { %4393 = vmatprep.subr.bf16.mxu0 %v4693_v11  ;;  %4415 = vmatprep.subr.bf16.mxu1 %v4694_v14  ;;  %v4714_v11 = vld [vmem:[#allocation4 + $0x2c8] sm:$0xff]  }
 0x1b7   :  { %v4715_v14 = vld [vmem:[#allocation4 + $0x208] sm:$0xff]  }
 0x1b9   :  { %4394 = vmatpush3.bf16.msra.mxu0 %v4695_v15  ;;  %4416 = vmatpush3.bf16.msra.mxu1 %v4696_v16  ;;  %v4716_v15 = vld [vmem:[#allocation4 + $0x288] sm:$0xff]   ;;  %v4717_v16 = vld [vmem:[#allocation4 + $0x250] sm:$0xff]  }
 0x1ba   :  { %4395 = vmatprep.subr.bf16.mxu0 %v4697_v18  ;;  %4417 = vmatprep.subr.bf16.mxu1 %v4698_v21  ;;  %v4718_v18 = vld [vmem:[#allocation4 + $0x2d0] sm:$0xff]  }
 0x1bb   :  { %v4720_v21 = vld [vmem:[#allocation4 + $0x290] sm:$0xff]  }
 0x1bd   :  { %4396 = vmatpush3.bf16.msra.mxu0 %v4699_v27  ;;  %v1717_v33 = vpop.f32.mrb[4].mxu0  ;;  %4418 = vmatpush3.bf16.msra.mxu1 %v4700_v28  ;;  %v1760_v12 = vpop.f32.mrb[4].mxu1  ;;  %v4724_v27 = vld [vmem:[#allocation4 + $0x298] sm:$0xff]   ;;  %v4725_v28 = vld [vmem:[#allocation4 + $0x260] sm:$0xff]  }
 0x1be   :  { %v1831_v36 = vadd.f32 %v1806_v29, %v1717_v33  ;;  %v1719_v37 = vpop.f32.mrb[5].mxu0  ;;  %4397 = vmatprep.subr.bf16.mxu0 %v4701_v30  ;;  %v1833_v41 = vadd.f32 %v1814_v4, %v1760_v12  ;;  %v1762_v43 = vpop.f32.mrb[5].mxu1  ;;  %4419 = vmatprep.subr.bf16.mxu1 %v4702_v31  ;;  %v4727_v30 = vld [vmem:[#allocation4 + $0x220] sm:$0xff]   ;;  %v4730_v31 = vld [vmem:[#allocation4 + $0x2e8] sm:$0xff]   ;;  %v4735_v12 = vld [vmem:[#allocation4 + $0x230] sm:$0xff]  }
 0x1bf   :  { %v1832_v42 = vadd.f32 %v1810_v23, %v1719_v37  ;;  %v1721_v44 = vpop.f32.mrb[6].mxu0  ;;  %v1834_v47 = vadd.f32 %v1818_v32, %v1762_v43  ;;  %v1764_v49 = vpop.f32.mrb[6].mxu1  ;;  %v4732_v33 = vld [vmem:[#allocation4 + $0x2a8] sm:$0xff]   ;;  %v4736_v37 = vld [vmem:[#allocation4 + $0x2b0] sm:$0xff]   ;;  %v4741_v43 = vld [vmem:[#allocation4 + $0x340] sm:$0xff]  }
 0x1c0   :  { %v1839_v48 = vadd.f32 %v1806_v29, %v1721_v44  ;;  %v1723_v0 = vpop.f32.mrb[7].mxu0  ;;  %v1841_v50 = vadd.f32 %v1814_v4, %v1764_v49  ;;  %v1766_v52 = vpop.f32.mrb[7].mxu1  ;;  %v1847_v54 = vmax.f32 %v1831_v36, 0.0  ;;  %v1849_v13 = vmax.f32 %v1833_v41, 0.0  ;;  %v4726_v29 = vld [vmem:[#allocation4 + $0x2e0] sm:$0xff]   ;;  %v4734_v36 = vld [vmem:[#allocation4 + $0x2f0] sm:$0xff]  }
 0x1c1   :  { %v1840_v51 = vadd.f32 %v1810_v23, %v1723_v0  ;;  %4398 = vmatpush3.bf16.msra.mxu0 %v4703_v34  ;;  %v1842_v56 = vadd.f32 %v1818_v32, %v1766_v52  ;;  %4420 = vmatpush3.bf16.msra.mxu1 %v4704_v38  ;;  %v1848_v61 = vmax.f32 %v1832_v42, 0.0  ;;  %v1850_v35 = vmax.f32 %v1834_v47, 0.0  ;;  %v4728_v4 = vld [vmem:[#allocation4 + $0x2a0] sm:$0xff]   ;;  %v4729_v23 = vld [vmem:[#allocation4 + $0x268] sm:$0xff]   ;;  %v4733_v34 = vld [vmem:[#allocation4 + $0x270] sm:$0xff]  }
 0x1c2   :  { %v1855_v55 = vmax.f32 %v1839_v48, 0.0  ;;  %4399 = vmatprep.subr.bf16.mxu0 %v4705_v40  ;;  %v1857_v62 = vmax.f32 %v1841_v50, 0.0  ;;  %4421 = vmatprep.subr.bf16.mxu1 %v4706_v46  ;;  %v4731_v32 = vld [vmem:[#allocation4 + $0x228] sm:$0xff]   ;;  %v4737_v38 = vld [vmem:[#allocation4 + $0x278] sm:$0xff]   ;;  %v4742_v44 = vld [vmem:[#allocation4 + $0x3c0] sm:$0xff]  }
 0x1c3   :  { %v1856_v1 = vmax.f32 %v1840_v51, 0.0  ;;  %v1858_v58 = vmax.f32 %v1842_v56, 0.0  ;;  %v4738_v40 = vld [vmem:[#allocation4 + $0x2f8] sm:$0xff]   ;;  %v4743_v46 = vld [vmem:[#allocation4 + $0x300] sm:$0xff]   ;;  %v4745_v48 = vld [vmem:[#allocation4 + $0x348] sm:$0xff]  }
 0x1c4   :  { %v5093_v39 = vpack.c.bf16 %v1855_v55, %v1847_v54  ;;  %v5095_v2 = vpack.c.bf16 %v1857_v62, %v1849_v13  ;;  %v4739_v41 = vld [vmem:[#allocation4 + $0x238] sm:$0xff]   ;;  %v4744_v47 = vld [vmem:[#allocation4 + $0x380] sm:$0xff]   ;;  %v4746_v49 = vld [vmem:[#allocation4 + $0x3c8] sm:$0xff]  }
 0x1c5   :  { %v5097_v3 = vpack.c.bf16 %v1856_v1, %v1848_v61  ;;  %4400 = vmatpush3.bf16.msra.mxu0 %v4707_v53  ;;  %v5099_v8 = vpack.c.bf16 %v1858_v58, %v1850_v35  ;;  %4422 = vmatpush3.bf16.msra.mxu1 %v4708_v57  ;;  %v4740_v42 = vld [vmem:[#allocation4 + $0x2b8] sm:$0xff]   ;;  %v4747_v0 = vld [vmem:[#allocation4 + $0x308] sm:$0xff]   ;;  %v4749_v51 = vld [vmem:[#allocation4 + $0x350] sm:$0xff]  }
 0x1c6   :  { %4429 = vmatprep.subr.bf16.mxu0 %v4709_v5  ;;  %4451 = vmatprep.subr.bf16.mxu1 %v4710_v22  ;;  %v4748_v50 = vld [vmem:[#allocation4 + $0x388] sm:$0xff]   ;;  %v4750_v52 = vld [vmem:[#allocation4 + $0x3d0] sm:$0xff]   ;;  %v4753_v55 = vld [vmem:[#allocation4 + $0x358] sm:$0xff]  }
 0x1c7   :  { %2493 = vmatprep.mubr.bf16.mxu0 %v5097_v3  ;;  %2534 = vmatprep.mubr.bf16.mxu1 %v5099_v8  ;;  %v4751_v53 = vld [vmem:[#allocation4 + $0x310] sm:$0xff]   ;;  %v4754_v56 = vld [vmem:[#allocation4 + $0x3d8] sm:$0xff]   ;;  %v4757_v13 = vld [vmem:[#allocation4 + $0x360] sm:$0xff]  }
 0x1c8   :  { %2494 = vmatmul.mubr.bf16.vlgmr.msra.gmra.mrb[12].mxu0 %v5093_v39  ;;  %2535 = vmatmul.mubr.bf16.vlgmr.msra.gmra.mrb[12].mxu1 %v5095_v2  ;;  %v4752_v54 = vld [vmem:[#allocation4 + $0x390] sm:$0xff]   ;;  %v4755_v57 = vld [vmem:[#allocation4 + $0x318] sm:$0xff]   ;;  %v4758_v61 = vld [vmem:[#allocation4 + $0x3e0] sm:$0xff]  }
 0x1c9   :  { %4430 = vmatpush3.bf16.msra.mxu0 %v4711_v7  ;;  %4452 = vmatpush3.bf16.msra.mxu1 %v4712_v9  ;;  %v4756_v5 = vld [vmem:[#allocation4 + $0x398] sm:$0xff]   ;;  %v4759_v62 = vld [vmem:[#allocation4 + $0x320] sm:$0xff]   ;;  %v4761_v22 = vld [vmem:[#allocation4 + $0x368] sm:$0xff]  }
 0x1ca   :  { %3088 = vmatprep.mubr.bf16.mxu0 %v5077_v6  ;;  %3129 = vmatprep.mubr.bf16.mxu1 %v5079_v17  ;;  %v4760_v1 = vld [vmem:[#allocation4 + $0x3a0] sm:$0xff]   ;;  %v4762_v35 = vld [vmem:[#allocation4 + $0x3e8] sm:$0xff]   ;;  %v4765_v9 = vld [vmem:[#allocation4 + $0x370] sm:$0xff]  }
 0x1cb   :  { %4431 = vmatprep.subr.bf16.mxu0 %v4713_v10  ;;  %4453 = vmatprep.subr.bf16.mxu1 %v4714_v11  ;;  %v4763_v58 = vld [vmem:[#allocation4 + $0x328] sm:$0xff]   ;;  %v4766_v10 = vld [vmem:[#allocation4 + $0x3f0] sm:$0xff]  }
 0x1cc   :  { %v4764_v7 = vld [vmem:[#allocation4 + $0x3a8] sm:$0xff]   ;;  %v4767_v11 = vld [vmem:[#allocation4 + $0x330] sm:$0xff]  }
 0x1cd   :  { %4432 = vmatpush3.bf16.msra.mxu0 %v4715_v14  ;;  %4454 = vmatpush3.bf16.msra.mxu1 %v4716_v15  ;;  %v4768_v14 = vld [vmem:[#allocation4 + $0x3b0] sm:$0xff]   ;;  %v4769_v15 = vld [vmem:[#allocation4 + $0x378] sm:$0xff]  }
 0x1ce   :  { %4433 = vmatprep.subr.bf16.mxu0 %v4717_v16  ;;  %4455 = vmatprep.subr.bf16.mxu1 %v4718_v18  ;;  %v4770_v16 = vld [vmem:[#allocation4 + $0x3f8] sm:$0xff]  }
 0x1cf   :  { %v4771_v18 = vld [vmem:[#allocation4 + $0x338] sm:$0xff]  }
 0x1d1   :  { %4434 = vmatpush3.bf16.msra.mxu0 %v4719_v19  ;;  %4456 = vmatpush3.bf16.msra.mxu1 %v4720_v21  ;;  %v4772_v19 = vld [vmem:[#allocation4 + $0x3b8] sm:$0xff]   ;;  %v4773_v21 = vld [vmem:[#allocation4 + $0x440] sm:$0xff]  }
 0x1d2   :  { %4435 = vmatprep.subr.bf16.mxu0 %v4721_v24  ;;  %4457 = vmatprep.subr.bf16.mxu1 %v4722_v25  ;;  %v4774_v24 = vld [vmem:[#allocation4 + $0x4c0] sm:$0xff]  }
 0x1d3   :  { %v4775_v25 = vld [vmem:[#allocation4 + $0x400] sm:$0xff]  }
 0x1d5   :  { %4436 = vmatpush3.bf16.msra.mxu0 %v4723_v26  ;;  %4458 = vmatpush3.bf16.msra.mxu1 %v4724_v27  ;;  %v4776_v26 = vld [vmem:[#allocation4 + $0x480] sm:$0xff]   ;;  %v4777_v27 = vld [vmem:[#allocation4 + $0x448] sm:$0xff]  }
 0x1d6   :  { %4437 = vmatprep.subr.bf16.mxu0 %v4725_v28  ;;  %4459 = vmatprep.subr.bf16.mxu1 %v4726_v29  ;;  %v4778_v28 = vld [vmem:[#allocation4 + $0x4c8] sm:$0xff]  }
 0x1d7   :  { %v4779_v29 = vld [vmem:[#allocation4 + $0x408] sm:$0xff]  }
 0x1d9   :  { %4438 = vmatpush3.bf16.msra.mxu0 %v4727_v30  ;;  %4460 = vmatpush3.bf16.msra.mxu1 %v4728_v4  ;;  %v4780_v30 = vld [vmem:[#allocation4 + $0x488] sm:$0xff]   ;;  %v4781_v4 = vld [vmem:[#allocation4 + $0x450] sm:$0xff]  }
 0x1da   :  { %4439 = vmatprep.subr.bf16.mxu0 %v4729_v23  ;;  %4461 = vmatprep.subr.bf16.mxu1 %v4730_v31  ;;  %v4782_v23 = vld [vmem:[#allocation4 + $0x4d0] sm:$0xff]  }
 0x1db   :  { %v4783_v31 = vld [vmem:[#allocation4 + $0x410] sm:$0xff]  }
 0x1dd   :  { %4440 = vmatpush3.bf16.msra.mxu0 %v4731_v32  ;;  %4462 = vmatpush3.bf16.msra.mxu1 %v4732_v33  ;;  %v4784_v32 = vld [vmem:[#allocation4 + $0x490] sm:$0xff]   ;;  %v4785_v33 = vld [vmem:[#allocation4 + $0x458] sm:$0xff]  }
 0x1de   :  { %4441 = vmatprep.subr.bf16.mxu0 %v4733_v34  ;;  %4463 = vmatprep.subr.bf16.mxu1 %v4734_v36  ;;  %v4786_v34 = vld [vmem:[#allocation4 + $0x4d8] sm:$0xff]  }
 0x1df   :  { %v4787_v36 = vld [vmem:[#allocation4 + $0x418] sm:$0xff]  }
 0x1e1   :  { %4442 = vmatpush3.bf16.msra.mxu0 %v4735_v12  ;;  %4464 = vmatpush3.bf16.msra.mxu1 %v4736_v37  ;;  %v4789_v12 = vld [vmem:[#allocation4 + $0x460] sm:$0xff]  }
 0x1e2   :  { %4443 = vmatprep.subr.bf16.mxu0 %v4737_v38  ;;  %4465 = vmatprep.subr.bf16.mxu1 %v4738_v40  ;;  %v4790_v37 = vld [vmem:[#allocation4 + $0x4e0] sm:$0xff]   ;;  %v4793_v40 = vld [vmem:[#allocation4 + $0x468] sm:$0xff]  }
 0x1e3   :  { %v4792_v38 = vld [vmem:[#allocation4 + $0x4a0] sm:$0xff]  }
 0x1e5   :  { %4444 = vmatpush3.bf16.msra.mxu0 %v4739_v41  ;;  %4466 = vmatpush3.bf16.msra.mxu1 %v4740_v42  ;;  %v4794_v41 = vld [vmem:[#allocation4 + $0x4e8] sm:$0xff]  }
 0x1e6   :  { %4473 = vmatprep.subr.bf16.mxu0 %v4741_v43  ;;  %4495 = vmatprep.subr.bf16.mxu1 %v4742_v44  ;;  %v4795_v42 = vld [vmem:[#allocation4 + $0x428] sm:$0xff]   ;;  %v4797_v44 = vld [vmem:[#allocation4 + $0x470] sm:$0xff]  }
 0x1e7   :  { %v4796_v43 = vld [vmem:[#allocation4 + $0x4a8] sm:$0xff]  }
 0x1e8   :  { %3089 = vmatmul.mubr.bf16.vlgmr.msra.gmra.mrb[16].mxu0 %v5073_v59  ;;  %3130 = vmatmul.mubr.bf16.vlgmr.msra.gmra.mrb[16].mxu1 %v5075_v60 }
 0x1e9   :  { %4474 = vmatpush3.bf16.msra.mxu0 %v4743_v46  ;;  %3170 = vmatprep.mubr.bf16.mxu0 %v5097_v3  ;;  %v4798_v46 = vld [vmem:[#allocation4 + $0x4f0] sm:$0xff]  }
 0x1ea   :  { %4496 = vmatpush3.bf16.msra.mxu1 %v4744_v47  ;;  %3211 = vmatprep.mubr.bf16.mxu1 %v5099_v8  ;;  %v4799_v47 = vld [vmem:[#allocation4 + $0x430] sm:$0xff]  }
 0x1eb   :  { %4475 = vmatprep.subr.bf16.mxu0 %v4745_v48  ;;  %4497 = vmatprep.subr.bf16.mxu1 %v4746_v49  ;;  %v4800_v48 = vld [vmem:[#allocation4 + $0x4b0] sm:$0xff]   ;;  %v4801_v49 = vld [vmem:[#allocation4 + $0x478] sm:$0xff]  }
 0x1ed   :  { %4476 = vmatpush3.bf16.msra.mxu0 %v4747_v0  ;;  %v4802_v0 = vld [vmem:[#allocation4 + $0x4f8] sm:$0xff]  }
 0x1ee   :  { %4498 = vmatpush3.bf16.msra.mxu1 %v4748_v50  ;;  %4477 = vmatprep.subr.bf16.mxu0 %v4749_v51  ;;  %v4803_v50 = vld [vmem:[#allocation4 + $0x438] sm:$0xff]  }
 0x1ef   :  { %4499 = vmatprep.subr.bf16.mxu1 %v4750_v52  ;;  %v4804_v51 = vld [vmem:[#allocation4 + $0x4b8] sm:$0xff]   ;;  %v4805_v52 = vld [vmem:[#allocation4 + $0x540] sm:$0xff]  }
 0x1f1   :  { %4478 = vmatpush3.bf16.msra.mxu0 %v4751_v53  ;;  %v4806_v53 = vld [vmem:[#allocation4 + $0x5c0] sm:$0xff]  }
 0x1f2   :  { %4500 = vmatpush3.bf16.msra.mxu1 %v4752_v54  ;;  %4479 = vmatprep.subr.bf16.mxu0 %v4753_v55  ;;  %v4807_v54 = vld [vmem:[#allocation4 + $0x500] sm:$0xff]  }
 0x1f3   :  { %4501 = vmatprep.subr.bf16.mxu1 %v4754_v56  ;;  %v4808_v55 = vld [vmem:[#allocation4 + $0x580] sm:$0xff]   ;;  %v4809_v56 = vld [vmem:[#allocation4 + $0x548] sm:$0xff]  }
 0x1f5   :  { %4480 = vmatpush3.bf16.msra.mxu0 %v4755_v57  ;;  %v4810_v57 = vld [vmem:[#allocation4 + $0x5c8] sm:$0xff]  }
 0x1f6   :  { %4502 = vmatpush3.bf16.msra.mxu1 %v4756_v5  ;;  %4481 = vmatprep.subr.bf16.mxu0 %v4757_v13  ;;  %v4811_v5 = vld [vmem:[#allocation4 + $0x508] sm:$0xff]  }
 0x1f7   :  { %4503 = vmatprep.subr.bf16.mxu1 %v4758_v61  ;;  %v4812_v13 = vld [vmem:[#allocation4 + $0x588] sm:$0xff]   ;;  %v4813_v61 = vld [vmem:[#allocation4 + $0x550] sm:$0xff]  }
 0x1f9   :  { %4482 = vmatpush3.bf16.msra.mxu0 %v4759_v62  ;;  %v4814_v62 = vld [vmem:[#allocation4 + $0x5d0] sm:$0xff]  }
 0x1fa   :  { %4504 = vmatpush3.bf16.msra.mxu1 %v4760_v1  ;;  %4483 = vmatprep.subr.bf16.mxu0 %v4761_v22  ;;  %v4815_v1 = vld [vmem:[#allocation4 + $0x510] sm:$0xff]   ;;  %v4817_v22 = vld [vmem:[#allocation4 + $0x558] sm:$0xff]  }
 0x1fb   :  { %4505 = vmatprep.subr.bf16.mxu1 %v4762_v35  ;;  %v4819_v35 = vld [vmem:[#allocation4 + $0x518] sm:$0xff]  }
 0x1fd   :  { %4484 = vmatpush3.bf16.msra.mxu0 %v4763_v58  ;;  %v4821_v58 = vld [vmem:[#allocation4 + $0x560] sm:$0xff]  }
 0x1fe   :  { %4506 = vmatpush3.bf16.msra.mxu1 %v4764_v7  ;;  %4485 = vmatprep.subr.bf16.mxu0 %v4765_v9  ;;  %v4822_v7 = vld [vmem:[#allocation4 + $0x5e0] sm:$0xff]  }
 0x1ff   :  { %4507 = vmatprep.subr.bf16.mxu1 %v4766_v10  ;;  %v4824_v9 = vld [vmem:[#allocation4 + $0x5a0] sm:$0xff]   ;;  %v4825_v10 = vld [vmem:[#allocation4 + $0x568] sm:$0xff]  }
 0x201   :  { %4486 = vmatpush3.bf16.msra.mxu0 %v4767_v11  ;;  %v4826_v11 = vld [vmem:[#allocation4 + $0x5e8] sm:$0xff]  }
 0x202   :  { %4508 = vmatpush3.bf16.msra.mxu1 %v4768_v14  ;;  %4487 = vmatprep.subr.bf16.mxu0 %v4769_v15  ;;  %v4827_v14 = vld [vmem:[#allocation4 + $0x528] sm:$0xff]  }
 0x203   :  { %4509 = vmatprep.subr.bf16.mxu1 %v4770_v16  ;;  %v4828_v15 = vld [vmem:[#allocation4 + $0x5a8] sm:$0xff]   ;;  %v4829_v16 = vld [vmem:[#allocation4 + $0x570] sm:$0xff]  }
 0x205   :  { %4488 = vmatpush3.bf16.msra.mxu0 %v4771_v18  ;;  %v4830_v18 = vld [vmem:[#allocation4 + $0x5f0] sm:$0xff]  }
 0x206   :  { %4510 = vmatpush3.bf16.msra.mxu1 %v4772_v19  ;;  %4517 = vmatprep.subr.bf16.mxu0 %v4773_v21  ;;  %v4831_v19 = vld [vmem:[#allocation4 + $0x530] sm:$0xff]  }
 0x207   :  { %4539 = vmatprep.subr.bf16.mxu1 %v4774_v24  ;;  %v4832_v21 = vld [vmem:[#allocation4 + $0x5b0] sm:$0xff]   ;;  %v4833_v24 = vld [vmem:[#allocation4 + $0x578] sm:$0xff]  }
 0x208   :  { %3171 = vmatmul.mubr.bf16.vlgmr.msra.gmra.mrb[20].mxu0 %v5093_v39 }
 0x209   :  { %3212 = vmatmul.mubr.bf16.vlgmr.msra.gmra.mrb[20].mxu1 %v5095_v2  ;;  %4518 = vmatpush3.bf16.msra.mxu0 %v4775_v25  ;;  %v4834_v25 = vld [vmem:[#allocation4 + $0x5f8] sm:$0xff]  }
 0x20a   :  { %3765 = vmatprep.mubr.bf16.mxu0 %v5077_v6  ;;  %4540 = vmatpush3.bf16.msra.mxu1 %v4776_v26  ;;  %v4788_v6 = vld [vmem:[#allocation4 + $0x498] sm:$0xff]  }
 0x20b   :  { %3806 = vmatprep.mubr.bf16.mxu1 %v5079_v17  ;;  %4519 = vmatprep.subr.bf16.mxu0 %v4777_v27  ;;  %v4791_v17 = vld [vmem:[#allocation4 + $0x420] sm:$0xff]   ;;  %v4835_v26 = vld [vmem:[#allocation4 + $0x538] sm:$0xff]  }
 0x20c   :  { %4541 = vmatprep.subr.bf16.mxu1 %v4778_v28  ;;  %v4836_v27 = vld [vmem:[#allocation4 + $0x5b8] sm:$0xff]  }
 0x20d   :  { %4520 = vmatpush3.bf16.msra.mxu0 %v4779_v29 }
 0x20e   :  { %4542 = vmatpush3.bf16.msra.mxu1 %v4780_v30  ;;  %4521 = vmatprep.subr.bf16.mxu0 %v4781_v4 }
 0x20f   :  { %4543 = vmatprep.subr.bf16.mxu1 %v4782_v23 }
 0x211   :  { %4522 = vmatpush3.bf16.msra.mxu0 %v4783_v31 }
 0x212   :  { %4544 = vmatpush3.bf16.msra.mxu1 %v4784_v32  ;;  %4523 = vmatprep.subr.bf16.mxu0 %v4785_v33 }
 0x213   :  { %4545 = vmatprep.subr.bf16.mxu1 %v4786_v34 }
 0x215   :  { %4524 = vmatpush3.bf16.msra.mxu0 %v4787_v36 }
 0x216   :  { %4546 = vmatpush3.bf16.msra.mxu1 %v4788_v6  ;;  %4525 = vmatprep.subr.bf16.mxu0 %v4789_v12 }
 0x217   :  { %4547 = vmatprep.subr.bf16.mxu1 %v4790_v37 }
 0x219   :  { %4526 = vmatpush3.bf16.msra.mxu0 %v4791_v17 }
 0x21a   :  { %4548 = vmatpush3.bf16.msra.mxu1 %v4792_v38  ;;  %4527 = vmatprep.subr.bf16.mxu0 %v4793_v40 }
 0x21b   :  { %4549 = vmatprep.subr.bf16.mxu1 %v4794_v41 }
 0x21d   :  { %4528 = vmatpush3.bf16.msra.mxu0 %v4795_v42 }
 0x21e   :  { %4550 = vmatpush3.bf16.msra.mxu1 %v4796_v43  ;;  %4529 = vmatprep.subr.bf16.mxu0 %v4797_v44 }
 0x21f   :  { %4551 = vmatprep.subr.bf16.mxu1 %v4798_v46 }
 0x221   :  { %4530 = vmatpush3.bf16.msra.mxu0 %v4799_v47 }
 0x222   :  { %4552 = vmatpush3.bf16.msra.mxu1 %v4800_v48  ;;  %4531 = vmatprep.subr.bf16.mxu0 %v4801_v49 }
 0x223   :  { %4553 = vmatprep.subr.bf16.mxu1 %v4802_v0 }
 0x225   :  { %4532 = vmatpush3.bf16.msra.mxu0 %v4803_v50 }
 0x226   :  { %4554 = vmatpush3.bf16.msra.mxu1 %v4804_v51  ;;  %4561 = vmatprep.subr.bf16.mxu0 %v4805_v52 }
 0x227   :  { %4583 = vmatprep.subr.bf16.mxu1 %v4806_v53 }
 0x228   :  { %3766 = vmatmul.mubr.bf16.vlgmr.msra.gmra.mrb[24].mxu0 %v5073_v59  ;;  %v4816_v59 = vld [vmem:[#allocation4 + $0x590] sm:$0xff]  }
 0x229   :  { %3807 = vmatmul.mubr.bf16.vlgmr.msra.gmra.mrb[24].mxu1 %v5075_v60  ;;  %4562 = vmatpush3.bf16.msra.mxu0 %v4807_v54  ;;  %v4818_v60 = vld [vmem:[#allocation4 + $0x5d8] sm:$0xff]  }
 0x22a   :  { %3847 = vmatprep.mubr.bf16.mxu0 %v5097_v3  ;;  %4584 = vmatpush3.bf16.msra.mxu1 %v4808_v55  ;;  %v4820_v3 = vld [vmem:[#allocation4 + $0x598] sm:$0xff]  }
 0x22b   :  { %3888 = vmatprep.mubr.bf16.mxu1 %v5099_v8  ;;  %4563 = vmatprep.subr.bf16.mxu0 %v4809_v56  ;;  %v4823_v8 = vld [vmem:[#allocation4 + $0x520] sm:$0xff]  }
 0x22c   :  { %4585 = vmatprep.subr.bf16.mxu1 %v4810_v57 }
 0x22d   :  { %4564 = vmatpush3.bf16.msra.mxu0 %v4811_v5 }
 0x22e   :  { %4586 = vmatpush3.bf16.msra.mxu1 %v4812_v13  ;;  %4565 = vmatprep.subr.bf16.mxu0 %v4813_v61 }
 0x22f   :  { %4587 = vmatprep.subr.bf16.mxu1 %v4814_v62 }
 0x231   :  { %4566 = vmatpush3.bf16.msra.mxu0 %v4815_v1 }
 0x232   :  { %4588 = vmatpush3.bf16.msra.mxu1 %v4816_v59  ;;  %4567 = vmatprep.subr.bf16.mxu0 %v4817_v22 }
 0x233   :  { %4589 = vmatprep.subr.bf16.mxu1 %v4818_v60 }
 0x235   :  { %4568 = vmatpush3.bf16.msra.mxu0 %v4819_v35 }
 0x236   :  { %4590 = vmatpush3.bf16.msra.mxu1 %v4820_v3  ;;  %4569 = vmatprep.subr.bf16.mxu0 %v4821_v58 }
 0x237   :  { %4591 = vmatprep.subr.bf16.mxu1 %v4822_v7 }
 0x239   :  { %4570 = vmatpush3.bf16.msra.mxu0 %v4823_v8 }
 0x23a   :  { %4592 = vmatpush3.bf16.msra.mxu1 %v4824_v9  ;;  %4571 = vmatprep.subr.bf16.mxu0 %v4825_v10 }
 0x23b   :  { %4593 = vmatprep.subr.bf16.mxu1 %v4826_v11 }
 0x23d   :  { %4572 = vmatpush3.bf16.msra.mxu0 %v4827_v14 }
 0x23e   :  { %4594 = vmatpush3.bf16.msra.mxu1 %v4828_v15  ;;  %4573 = vmatprep.subr.bf16.mxu0 %v4829_v16 }
 0x23f   :  { %4595 = vmatprep.subr.bf16.mxu1 %v4830_v18 }
 0x241   :  { %4574 = vmatpush3.bf16.msra.mxu0 %v4831_v19 }
 0x242   :  { %4596 = vmatpush3.bf16.msra.mxu1 %v4832_v21  ;;  %4575 = vmatprep.subr.bf16.mxu0 %v4833_v24 }
 0x243   :  { %4597 = vmatprep.subr.bf16.mxu1 %v4834_v25 }
 0x245   :  { %4576 = vmatpush3.bf16.msra.mxu0 %v4835_v26 }
 0x246   :  { %4598 = vmatpush3.bf16.msra.mxu1 %v4836_v27 }
 0x248   :  { %3848 = vmatmul.mubr.bf16.vlgmr.msra.gmra.mrb[28].mxu0 %v5093_v39 }
 0x249   :  { %3889 = vmatmul.mubr.bf16.vlgmr.msra.gmra.mrb[28].mxu1 %v5095_v2 }
 0x27b   :  { %v4357_v28 = vpop.f32.mrb[8].mxu0  ;;  %v4379_v29 = vpop.f32.mrb[8].mxu1 }
 0x27c   :  { %v4358_v30 = vpop.f32.mrb[9].mxu0  ;;  %v4380_v23 = vpop.f32.mrb[9].mxu1 }
 0x27d   :  { %v4359_v4 = vadd.f32 %v4358_v30, %v4357_v28  ;;  %v4360_v31 = vpop.f32.mrb[10].mxu0  ;;  %v4381_v32 = vadd.f32 %v4380_v23, %v4379_v29  ;;  %v4382_v33 = vpop.f32.mrb[10].mxu1 }
 0x27e   :  { %v4361_v34 = vpop.f32.mrb[11].mxu0  ;;  %v4383_v6 = vpop.f32.mrb[11].mxu1 }
 0x27f   :  { %v4362_v36 = vadd.f32 %v4361_v34, %v4360_v31  ;;  %v2455_v12 = vadd.f32 %v4381_v32, %v4359_v4  ;;  %v4384_v37 = vadd.f32 %v4383_v6, %v4382_v33 }
 0x281   :  { %v2458_v17 = vadd.f32 %v4384_v37, %v4362_v36 }
 0x29b   :  { %v4401_v38 = vpop.f32.mrb[12].mxu0  ;;  %v4423_v40 = vpop.f32.mrb[12].mxu1 }
 0x29c   :  { %v4402_v41 = vpop.f32.mrb[13].mxu0  ;;  %v4424_v42 = vpop.f32.mrb[13].mxu1 }
 0x29d   :  { %v4403_v39 = vadd.f32 %v4402_v41, %v4401_v38  ;;  %v4404_v2 = vpop.f32.mrb[14].mxu0  ;;  %v4425_v43 = vadd.f32 %v4424_v42, %v4423_v40  ;;  %v4426_v44 = vpop.f32.mrb[14].mxu1 }
 0x29e   :  { %v4405_v46 = vpop.f32.mrb[15].mxu0  ;;  %v4427_v49 = vpop.f32.mrb[15].mxu1 }
 0x29f   :  { %v2496_v47 = vadd.f32 %v4403_v39, %v2455_v12  ;;  %v4406_v48 = vadd.f32 %v4405_v46, %v4404_v2  ;;  %v4428_v0 = vadd.f32 %v4427_v49, %v4426_v44 }
 0x2a1   :  { %v2537_v50 = vadd.f32 %v4425_v43, %v2496_v47  ;;  %v2499_v51 = vadd.f32 %v4406_v48, %v2458_v17 }
 0x2a3   :  { %v2540_v52 = vadd.f32 %v4428_v0, %v2499_v51  ;;  %v3897_v53 = vrot.slane %v2537_v50, 7 }
 0x2a5   :  { %v3898_v54 = vrot.slane %v2540_v52, 7 }
 0x2a7   :  { %v3900_v55 = vsel %vm84_vm0, %v3898_v54, %v3897_v53  ;;  %v3899_v56 = vsel %vm84_vm0, %v3897_v53, %v3898_v54 }
 0x2a8   :  { %v3901_v30 = vsel %vm4977_vm1, %v3900_v55, 0.0 }
 0x2bb   :  { %v4445_v57 = vpop.f32.mrb[16].mxu0  ;;  %v4467_v5 = vpop.f32.mrb[16].mxu1 }
 0x2bc   :  { %v4446_v13 = vpop.f32.mrb[17].mxu0  ;;  %v4468_v62 = vpop.f32.mrb[17].mxu1 }
 0x2bd   :  { %v4447_v61 = vadd.f32 %v4446_v13, %v4445_v57  ;;  %v4448_v1 = vpop.f32.mrb[18].mxu0  ;;  %v4469_v59 = vadd.f32 %v4468_v62, %v4467_v5  ;;  %v4470_v22 = vpop.f32.mrb[18].mxu1 }
 0x2be   :  { %v4449_v60 = vpop.f32.mrb[19].mxu0  ;;  %v4471_v3 = vpop.f32.mrb[19].mxu1 }
 0x2bf   :  { %v4450_v35 = vadd.f32 %v4449_v60, %v4448_v1  ;;  %v3132_v58 = vadd.f32 %v4469_v59, %v4447_v61  ;;  %v4472_v7 = vadd.f32 %v4471_v3, %v4470_v22  ;;  %v4340_v60 = vld [vmem:[%s5152_s4] ss:$0 sm:$0xff] }
 0x2c1   :  { %v3135_v8 = vadd.f32 %v4472_v7, %v4450_v35  ;;  %v4837_v35 = vld [vmem:[%s5148_s0] sm:$0xff] }
 0x2db   :  { %v4489_v9 = vpop.f32.mrb[20].mxu0 }
 0x2dc   :  { %v4511_v10 = vpop.f32.mrb[20].mxu1  ;;  %v4490_v11 = vpop.f32.mrb[21].mxu0 }
 0x2dd   :  { %v4491_v14 = vadd.f32 %v4490_v11, %v4489_v9  ;;  %v4512_v15 = vpop.f32.mrb[21].mxu1  ;;  %v4492_v16 = vpop.f32.mrb[22].mxu0 }
 0x2de   :  { %v4513_v18 = vadd.f32 %v4512_v15, %v4511_v10  ;;  %v4514_v19 = vpop.f32.mrb[22].mxu1  ;;  %v4493_v21 = vpop.f32.mrb[23].mxu0 }
 0x2df   :  { %v3173_v24 = vadd.f32 %v4491_v14, %v3132_v58  ;;  %v4494_v25 = vadd.f32 %v4493_v21, %v4492_v16  ;;  %v4515_v26 = vpop.f32.mrb[23].mxu1  ;;  %v4838_v58 = vld [vmem:[%s5148_s0 + $0x8] sm:$0xff] }
 0x2e0   :  { %v4516_v27 = vadd.f32 %v4515_v26, %v4514_v19 }
 0x2e1   :  { %v3214_v28 = vadd.f32 %v4513_v18, %v3173_v24  ;;  %v3176_v29 = vadd.f32 %v4494_v25, %v3135_v8 }
 0x2e3   :  { %v3903_v4 = vadd.f32 %v3901_v30, %v3214_v28  ;;  %v3217_v23 = vadd.f32 %v4516_v27, %v3176_v29 }
 0x2e5   :  { %v3904_v31 = vadd.f32 %v3899_v56, %v3217_v23 }
 0x2fb   :  { %v4533_v32 = vpop.f32.mrb[24].mxu0 }
 0x2fc   :  { %v4555_v33 = vpop.f32.mrb[24].mxu1  ;;  %v4534_v34 = vpop.f32.mrb[25].mxu0 }
 0x2fd   :  { %v4535_v36 = vadd.f32 %v4534_v34, %v4533_v32  ;;  %v4556_v6 = vpop.f32.mrb[25].mxu1  ;;  %v4536_v12 = vpop.f32.mrb[26].mxu0 }
 0x2fe   :  { %v4557_v37 = vadd.f32 %v4556_v6, %v4555_v33  ;;  %v4558_v17 = vpop.f32.mrb[26].mxu1  ;;  %v4537_v38 = vpop.f32.mrb[27].mxu0 }
 0x2ff   :  { %v4538_v40 = vadd.f32 %v4537_v38, %v4536_v12  ;;  %v4559_v41 = vpop.f32.mrb[27].mxu1 }
 0x300   :  { %v3809_v39 = vadd.f32 %v4557_v37, %v4535_v36  ;;  %v4560_v42 = vadd.f32 %v4559_v41, %v4558_v17 }
 0x302   :  { %v3812_v2 = vadd.f32 %v4560_v42, %v4538_v40 }
 0x31b   :  { %v4577_v43 = vpop.f32.mrb[28].mxu0 }
 0x31c   :  { %v4599_v63 = vpop.f32.mrb[28].mxu1  ;;  %v4578_v44 = vpop.f32.mrb[29].mxu0 }
 0x31d   :  { %v4579_v46 = vadd.f32 %v4578_v44, %v4577_v43  ;;  %v4600_v47 = vpop.f32.mrb[29].mxu1  ;;  %v4580_v48 = vpop.f32.mrb[30].mxu0 }
 0x31e   :  { %v4601_v49 = vadd.f32 %v4600_v47, %v4599_v63  ;;  %v4602_v0 = vpop.f32.mrb[30].mxu1  ;;  %v4581_v50 = vpop.f32.mrb[31].mxu0 }
 0x31f   :  { %v3850_v51 = vadd.f32 %v4579_v46, %v3809_v39  ;;  %v4582_v52 = vadd.f32 %v4581_v50, %v4580_v48  ;;  %v4603_v53 = vpop.f32.mrb[31].mxu1 }
 0x320   :  { %v4604_v54 = vadd.f32 %v4603_v53, %v4602_v0 }
 0x321   :  { %v3891_v55 = vadd.f32 %v4601_v49, %v3850_v51  ;;  %v3853_v56 = vadd.f32 %v4582_v52, %v3812_v2 }
 0x323   :  { %v3894_v57 = vadd.f32 %v4604_v54, %v3853_v56  ;;  %v3905_v5 = vrot.slane %v3891_v55, 1 }
 0x325   :  { %v3906_v13 = vrot.slane %v3894_v57, 1 }
 0x327   :  { %v3907_v61 = vsel %vm1206_vm5, %v3905_v5, %v3906_v13  ;;  %v3908_v62 = vsel %vm1206_vm5, %v3906_v13, %v3905_v5 }
 0x328   :  { %v3910_v1 = vsel %vm5020_vm4, %v3908_v62, 0.0  ;;  %v3911_v59 = vadd.f32 %v3907_v61, %v3903_v4 }
 0x329   :  { %v3912_v22 = vadd.f32 %v3910_v1, %v3904_v31 }
 0x32a   :  { %v3913_v3 = vadd.f32 %v4837_v35, %v3911_v59 }
 0x32b   :  { %v3914_v45 = vadd.f32 %v4838_v58, %v3912_v22 }
 0x32c   :  { %v3922_v7 = vadd.f32 %v4340_v60, %v3913_v3 }
 0x32d   :  { %v3923_v8 = vadd.f32 %v4340_v60, %v3914_v45 }
 0x32e   :  { %3924 = vst [vmem:[%s5153_s5] sm:$0xff] %v3922_v7 }
 0x32f   :  { %3925 = vst [vmem:[%s5153_s5 + $0x8] sm:$0xff] %v3923_v8 }
 0x330   :  { %3930 = vsyncpa [#allocation3], 1 }
 0x331   :  { %3931 = vsyncpa [#allocation5], 1 }

</bundles_post_ra>
